<compile_context>
chip_gen: v7x
topology: tpu7x:2x2x1
jax: 0.10.0
libtpu: 0.0.40
codegen_flags: <defaults>
</compile_context>

<pallas_src>
import functools

import jax
import jax.numpy as jnp
from jax.experimental import pallas as pl
from jax.experimental.pallas import tpu as pltpu


def _gnn_kernel(theta_ref, x_ref, w2t_ref, w1t_ref, b1_ref, lapA_hbm,
                o_ref, lapA_vmem, dma_sem,
                *, c, a, k, n_real, mm_dtype, bf16_exp):
    f32 = jnp.float32
    Np = x_ref.shape[0]

    # Overlap the lapA HBM->VMEM load with the embedding / similarity compute.
    cp = pltpu.make_async_copy(lapA_hbm, lapA_vmem, dma_sem)
    cp.start()

    x = x_ref[...]                 # (Np, Din_p) f32, zero-padded rows / lanes
    w2t = w2t_ref[...]             # (Din_p, Dout_p) f32 == linear2.weight.T
    b1 = b1_ref[...]               # (1, Dout_p) f32

    # ---- linear2 (no bias): h = x @ W2^T  (kept f32: feeds the distance) ----
    h = jnp.dot(x, w2t, preferred_element_type=f32)              # (Np, Dout_p)

    # ---- pairwise Euclidean distance via the gram matrix ----
    # dot_general contracts the feature dims of h against itself directly, so
    # no (N, Dout) transpose buffer is materialized.  Padded lanes/rows of h
    # are exactly zero and do not contribute.
    sq = jnp.sum(h * h, axis=-1, keepdims=True)                  # (Np, 1)
    gram = jax.lax.dot_general(h, h, (((1,), (1,)), ((), ())),
                               preferred_element_type=f32)       # (Np, Np)
    d2 = jnp.maximum(sq + sq.T - 2.0 * gram, 0.0)
    dist = jnp.sqrt(d2 + 1e-10)
    if bf16_exp:
        # S in (0, 1]; bf16 EUP exp is ~2x throughput on v6e/v7x.
        S = jnp.exp((dist * c).astype(jnp.bfloat16)).astype(f32)
    else:
        S = jnp.exp(dist * c)          # c = -1 / (2*sigma), folded on host

    if Np != n_real:
        # Padded rows of h are zero but exp(-dist) != 0 there, so explicitly
        # zero padded rows AND columns of S before any row sum.
        row = jax.lax.broadcasted_iota(jnp.int32, (Np, 1), 0)
        mask = (row < n_real).astype(f32)                        # (Np, 1)
        S = S * mask * mask.T

    # ---- normalized "Laplacian"  D^{-1/2} M D^{-1/2}, guarded for pad rows --
    def lap(M):
        rs = jnp.sum(M, axis=-1, keepdims=True)                  # (Np, 1)
        dinv = jnp.where(rs > 0.0, jax.lax.rsqrt(rs), 0.0)
        return dinv * M * dinv.T

    lapS = lap(S)

    cp.wait()                              # lapA resident in VMEM from here on
    L = lap(lapA_vmem[...] + a * lapS)     # lapA precomputed on host

    # ---- polynomial applied directly to x (never materialize P/seg/I) ----
    #   y = x + sum_i sigmoid(theta)_i * (L^(i+1) @ x)
    Lm = L.astype(mm_dtype)                # f32 L dead after this cast
    y = x
    t = x.astype(mm_dtype)                 # hoisted out of the loop
    for i in range(k):
        tf = jnp.dot(Lm, t, preferred_element_type=f32)          # (Np, Din_p)
        y = y + theta_ref[0, i] * tf
        if i + 1 < k:
            t = tf.astype(mm_dtype)

    # ---- linear1 (with bias); w1t already pre-cast to mm_dtype on host ----
    out = jnp.dot(y.astype(mm_dtype), w1t_ref[...],
                  preferred_element_type=f32) + b1               # (Np, Dout_p)
    o_ref[...] = out.astype(o_ref.dtype)


def _round_up(v, m):
    return ((v + m - 1) // m) * m


def _vmem_limit_bytes():
    """~3/4 of physical VMEM: ≈48 MiB on v7x, ≈96 MiB on v5e/v6e."""
    fallback = 64 * 1024 * 1024          # conservative (v7x physical VMEM)
    try:
        info = pltpu.get_tpu_info()
        phys = int(getattr(info, "vmem_capacity_bytes", fallback))
    except Exception:
        phys = fallback
    return int(phys * 3 // 4)


def _lap_host(M):
    dinv = jax.lax.rsqrt(jnp.sum(M, axis=-1, keepdims=True))
    return dinv * M * dinv.T


def _gnn_layer_forward(x, A, w1, b1, w2, theta, *, sigma=1.0, a=1.0, k=2,
                       use_bf16_matmul=True, use_bf16_exp=None):
    """x: (N, Din), A: (N, N), w1/w2: (Dout, Din) torch layout, b1: (Dout,),
    theta: (k,).  Returns (N, Dout) float32."""
    N, Din = x.shape
    Dout = w1.shape[0]
    f32 = jnp.float32
    mm_dtype = jnp.bfloat16 if use_bf16_matmul else f32
    if use_bf16_exp is None:
        use_bf16_exp = bool(use_bf16_matmul)   # set False explicitly on v5e

    # ---- host-side layout / padding / pre-cast glue (fused under jit) ----
    LANE = 128
    Np = _round_up(N, LANE)          # lane/sublane-dense NxN tiles + matmuls
    Din_p = _round_up(Din, LANE)
    Dout_p = _round_up(Dout, LANE)

    x_p = jnp.pad(jnp.asarray(x, f32), ((0, Np - N), (0, Din_p - Din)))
    lapA = _lap_host(jnp.asarray(A, f32))            # graph-only, precomputed
    lapA_p = jnp.pad(lapA, ((0, Np - N), (0, Np - N)))
    w2t_p = jnp.pad(jnp.asarray(w2, f32).T,
                    ((0, Din_p - Din), (0, Dout_p - Dout)))       # f32 (dist)
    w1t_p = jnp.pad(jnp.asarray(w1, f32).T,
                    ((0, Din_p - Din), (0, Dout_p - Dout))).astype(mm_dtype)
    b1_p = jnp.pad(jnp.asarray(b1, f32).reshape(1, Dout),
                   ((0, 0), (0, Dout_p - Dout)))
    theta_sig = jax.nn.sigmoid(jnp.asarray(theta, f32)).reshape(1, k)

    kernel = functools.partial(
        _gnn_kernel, c=float(-0.5 / sigma), a=float(a), k=int(k),
        n_real=int(N), mm_dtype=mm_dtype, bf16_exp=bool(use_bf16_exp))

    out_p = pl.pallas_call(
        kernel,
        out_shape=jax.ShapeDtypeStruct((Np, Dout_p), f32),
        in_specs=[
            pl.BlockSpec(memory_space=pltpu.MemorySpace.SMEM),   # theta (1, k)
            pl.BlockSpec(memory_space=pltpu.MemorySpace.VMEM),   # x (padded)
            pl.BlockSpec(memory_space=pltpu.MemorySpace.VMEM),   # W2^T
            pl.BlockSpec(memory_space=pltpu.MemorySpace.VMEM),   # W1^T (mm_dtype)
            pl.BlockSpec(memory_space=pltpu.MemorySpace.VMEM),   # b1
            pl.BlockSpec(memory_space=pl.ANY),                   # lapA (HBM)
        ],
        out_specs=pl.BlockSpec(memory_space=pltpu.MemorySpace.VMEM),
        scratch_shapes=[
            pltpu.VMEM((Np, Np), f32),          # lapA landing buffer
            pltpu.SemaphoreType.DMA(()),        # its completion semaphore
        ],
        compiler_params=pltpu.CompilerParams(
            vmem_limit_bytes=_vmem_limit_bytes(),
        ),
    )(theta_sig, x_p, w2t_p, w1t_p, b1_p, lapA_p)

    return out_p[:N, :Dout]


gnn_layer_forward = jax.jit(
    _gnn_layer_forward,
    static_argnames=("sigma", "a", "k", "use_bf16_matmul", "use_bf16_exp"))


def gnn_layer_reference(x, A, w1, b1, w2, theta, *, sigma=1.0, a=1.0, k=2):
    """Pure-JAX transcription of the PyTorch forward (for validation)."""
    h = x @ w2.T                                   # linear2, no bias
    hT = h.T                                       # (Dout, N)
    diff = hT[:, :, None] - hT[:, None, :]         # (Dout, N, N)
    d2 = jnp.sum(diff ** 2, axis=-3) + 1e-10
    dist = jnp.sqrt(d2)
    S = jnp.exp(-dist / (2.0 * sigma))

    def lap(M):
        n = M.shape[-1]
        I = jnp.eye(n, dtype=M.dtype)
        D = jax.lax.rsqrt(jnp.sum(M, -1))[:, None] * I
        return D @ M @ D

    L = lap(A) + lap(S) * a
    L = lap(L)
    th = jax.nn.sigmoid(theta)
    I = jnp.eye(A.shape[-1], dtype=x.dtype)
    seg, P = I, I
    for i in range(k):
        seg = seg @ L
        P = P + seg * th[i]
    y = P @ x
    return y @ w1.T + b1


if __name__ == "__main__":
    # small, forward-consistent shapes: N nodes, Din input feats, Dout output feats
    N, Din, Dout, K = 8, 16, 32, 2

    key = jax.random.PRNGKey(0)
    kx, ka, kw1, kb1, kw2, kth = jax.random.split(key, 6)

    x = jax.random.normal(kx, (N, Din), dtype=jnp.float32)
    A_raw = jax.random.uniform(ka, (N, N), dtype=jnp.float32)
    A = 0.5 * (A_raw + A_raw.T)                    # symmetric, positive row sums

    # deterministic synthetic parameters (torch layout: weight (Dout, Din))
    w1 = jax.random.normal(kw1, (Dout, Din), dtype=jnp.float32) * 0.1
    b1 = jax.random.normal(kb1, (Dout,), dtype=jnp.float32) * 0.1
    w2 = jax.random.normal(kw2, (Dout, Din), dtype=jnp.float32) * 0.1
    theta = jax.random.normal(kth, (K,), dtype=jnp.float32)

    ref = gnn_layer_reference(x, A, w1, b1, w2, theta, sigma=1.0, a=1.0, k=K)

    # 1) exact path (f32 matmuls / f32 exp) -- tight tolerance vs. reference.
    out_f32 = jax.block_until_ready(
        gnn_layer_forward(x, A, w1, b1, w2, theta, sigma=1.0, a=1.0, k=K,
                          use_bf16_matmul=False))
    assert out_f32.shape == (N, Dout)
    assert jnp.allclose(out_f32, ref, atol=1e-4, rtol=1e-4), (
        f"f32 path max abs err {jnp.max(jnp.abs(out_f32 - ref))}")

    # 2) fast path (bf16-operand / f32-accumulate MXU matmuls, bf16 exp).
    out_bf16 = jax.block_until_ready(
        gnn_layer_forward(x, A, w1, b1, w2, theta, sigma=1.0, a=1.0, k=K,
                          use_bf16_matmul=True))
    assert out_bf16.shape == (N, Dout)
    assert jnp.allclose(out_bf16, ref, atol=3e-2, rtol=3e-2), (
        f"bf16 path max abs err {jnp.max(jnp.abs(out_bf16 - ref))}")

    # NOTE: self.leakyrelu is defined in __init__ but never used in forward().
    print("KERNEL_OK")
</pallas_src>

<mosaic_0001>
module attributes {stable_mosaic.version = 11 : i64} {
  func.func @_gnn_kernel(%arg0: memref<1x2xf32, #tpu.memory_space<smem>>, %arg1: memref<128x128xf32, #tpu.memory_space<vmem>>, %arg2: memref<128x128xf32, #tpu.memory_space<vmem>>, %arg3: memref<128x128xf32, #tpu.memory_space<vmem>>, %arg4: memref<1x128xf32, #tpu.memory_space<vmem>>, %arg5: memref<128x128xf32, #tpu.memory_space<any>>, %arg6: memref<128x128xf32, #tpu.memory_space<vmem>>, %arg7: memref<128x128xf32, #tpu.memory_space<vmem>>, %arg8: memref<!tpu.dma_semaphore, #tpu.memory_space<semaphore_mem>>) attributes {dimension_semantics = [], scalar_prefetch = 0 : i64, scratch_operands = 2 : i64, tpu.core_type = #tpu.core_type<tc>} {
    tpu.enqueue_dma source(%arg5 : memref<128x128xf32, #tpu.memory_space<any>>) target(%arg7 : memref<128x128xf32, #tpu.memory_space<vmem>>) target_semaphore(%arg8 : memref<!tpu.dma_semaphore, #tpu.memory_space<semaphore_mem>>)
    %c0 = arith.constant 0 : index
    %c0_0 = arith.constant 0 : index
    %0 = vector.load %arg1[%c0, %c0_0] : memref<128x128xf32, #tpu.memory_space<vmem>>, vector<128x128xf32>
    %c0_1 = arith.constant 0 : index
    %c0_2 = arith.constant 0 : index
    %1 = vector.load %arg2[%c0_1, %c0_2] : memref<128x128xf32, #tpu.memory_space<vmem>>, vector<128x128xf32>
    %c0_3 = arith.constant 0 : index
    %c0_4 = arith.constant 0 : index
    %2 = vector.load %arg4[%c0_3, %c0_4] : memref<1x128xf32, #tpu.memory_space<vmem>>, vector<1x128xf32>
    %cst = arith.constant dense<0.000000e+00> : vector<128x128xf32>
    %3 = tpu.matmul %0, %1, %cst {dimension_numbers = #tpu.dot_dimension_numbers<[1], [0], [0], [1], [0, 0, 1, 1], [], []>} : vector<128x128xf32>, vector<128x128xf32>, vector<128x128xf32> -> vector<128x128xf32>
    %4 = arith.mulf %3, %3 : vector<128x128xf32>
    %cst_5 = arith.constant dense<0.000000e+00> : vector<128xf32>
    %5 = vector.multi_reduction <add>, %4, %cst_5 [1] : vector<128x128xf32> to vector<128xf32>
    %6 = vector.shape_cast %5 : vector<128xf32> to vector<128x1xf32>
    %cst_6 = arith.constant dense<0.000000e+00> : vector<128x128xf32>
    %7 = tpu.matmul %3, %3, %cst_6 {dimension_numbers = #tpu.dot_dimension_numbers<[1], [1], [0], [0], [0, 0, 1, 0], [], []>} : vector<128x128xf32>, vector<128x128xf32>, vector<128x128xf32> -> vector<128x128xf32>
    %8 = tpu.transpose %6, [1, 0] : vector<128x1xf32> -> vector<1x128xf32>
    %9 = vector.broadcast %6 : vector<128x1xf32> to vector<128x128xf32>
    %10 = vector.broadcast %8 : vector<1x128xf32> to vector<128x128xf32>
    %11 = arith.addf %9, %10 : vector<128x128xf32>
    %cst_7 = arith.constant 2.000000e+00 : f32
    %12 = vector.broadcast %cst_7 : f32 to vector<128x128xf32>
    %13 = arith.mulf %12, %7 : vector<128x128xf32>
    %14 = arith.subf %11, %13 : vector<128x128xf32>
    %cst_8 = arith.constant 0.000000e+00 : f32
    %15 = vector.broadcast %cst_8 : f32 to vector<128x128xf32>
    %16 = arith.maximumf %14, %15 : vector<128x128xf32>
    %cst_9 = arith.constant 1.000000e-10 : f32
    %17 = vector.broadcast %cst_9 : f32 to vector<128x128xf32>
    %18 = arith.addf %16, %17 : vector<128x128xf32>
    %19 = math.sqrt %18 : vector<128x128xf32>
    %cst_10 = arith.constant -5.000000e-01 : f32
    %20 = vector.broadcast %cst_10 : f32 to vector<128x128xf32>
    %21 = arith.mulf %19, %20 : vector<128x128xf32>
    %22 = math.exp %21 : vector<128x128xf32>
    %23 = tpu.iota {dimensions = array<i32: 0>} : vector<128x1xi32>
    %c8_i32 = arith.constant 8 : i32
    %24 = vector.broadcast %c8_i32 : i32 to vector<128x1xi32>
    %25 = arith.cmpi slt, %23, %24 : vector<128x1xi32>
    %26 = arith.extui %25 : vector<128x1xi1> to vector<128x1xi32>
    %27 = arith.sitofp %26 : vector<128x1xi32> to vector<128x1xf32>
    %28 = vector.broadcast %27 : vector<128x1xf32> to vector<128x128xf32>
    %29 = arith.mulf %22, %28 : vector<128x128xf32>
    %30 = tpu.transpose %27, [1, 0] : vector<128x1xf32> -> vector<1x128xf32>
    %31 = vector.broadcast %30 : vector<1x128xf32> to vector<128x128xf32>
    %32 = arith.mulf %29, %31 : vector<128x128xf32>
    %cst_11 = arith.constant dense<0.000000e+00> : vector<128xf32>
    %33 = vector.multi_reduction <add>, %32, %cst_11 [1] : vector<128x128xf32> to vector<128xf32>
    %34 = vector.shape_cast %33 : vector<128xf32> to vector<128x1xf32>
    %cst_12 = arith.constant 0.000000e+00 : f32
    %35 = vector.broadcast %cst_12 : f32 to vector<128x1xf32>
    %36 = arith.cmpf ogt, %34, %35 : vector<128x1xf32>
    %37 = math.rsqrt %34 : vector<128x1xf32>
    %cst_13 = arith.constant 0.000000e+00 : f32
    %38 = vector.broadcast %cst_13 : f32 to vector<128x1xf32>
    %39 = arith.select %36, %37, %38 : vector<128x1xi1>, vector<128x1xf32>
    %40 = vector.broadcast %39 : vector<128x1xf32> to vector<128x128xf32>
    %41 = arith.mulf %40, %32 : vector<128x128xf32>
    %42 = tpu.transpose %39, [1, 0] : vector<128x1xf32> -> vector<1x128xf32>
    %43 = vector.broadcast %42 : vector<1x128xf32> to vector<128x128xf32>
    %44 = arith.mulf %41, %43 : vector<128x128xf32>
    tpu.wait_dma2 semaphore(%arg8 : memref<!tpu.dma_semaphore, #tpu.memory_space<semaphore_mem>>) src(%arg5 : memref<128x128xf32, #tpu.memory_space<any>>) dst(%arg7 : memref<128x128xf32, #tpu.memory_space<vmem>>)
    %c0_14 = arith.constant 0 : index
    %c0_15 = arith.constant 0 : index
    %45 = vector.load %arg7[%c0_14, %c0_15] : memref<128x128xf32, #tpu.memory_space<vmem>>, vector<128x128xf32>
    %cst_16 = arith.constant 1.000000e+00 : f32
    %46 = vector.broadcast %cst_16 : f32 to vector<128x128xf32>
    %47 = arith.mulf %46, %44 : vector<128x128xf32>
    %48 = arith.addf %45, %47 : vector<128x128xf32>
    %cst_17 = arith.constant dense<0.000000e+00> : vector<128xf32>
    %49 = vector.multi_reduction <add>, %48, %cst_17 [1] : vector<128x128xf32> to vector<128xf32>
    %50 = vector.shape_cast %49 : vector<128xf32> to vector<128x1xf32>
    %cst_18 = arith.constant 0.000000e+00 : f32
    %51 = vector.broadcast %cst_18 : f32 to vector<128x1xf32>
    %52 = arith.cmpf ogt, %50, %51 : vector<128x1xf32>
    %53 = math.rsqrt %50 : vector<128x1xf32>
    %cst_19 = arith.constant 0.000000e+00 : f32
    %54 = vector.broadcast %cst_19 : f32 to vector<128x1xf32>
    %55 = arith.select %52, %53, %54 : vector<128x1xi1>, vector<128x1xf32>
    %56 = vector.broadcast %55 : vector<128x1xf32> to vector<128x128xf32>
    %57 = arith.mulf %56, %48 : vector<128x128xf32>
    %58 = tpu.transpose %55, [1, 0] : vector<128x1xf32> -> vector<1x128xf32>
    %59 = vector.broadcast %58 : vector<1x128xf32> to vector<128x128xf32>
    %60 = arith.mulf %57, %59 : vector<128x128xf32>
    %cst_20 = arith.constant dense<0.000000e+00> : vector<128x128xf32>
    %61 = tpu.matmul %60, %0, %cst_20 {dimension_numbers = #tpu.dot_dimension_numbers<[1], [0], [0], [1], [0, 0, 1, 1], [], []>} : vector<128x128xf32>, vector<128x128xf32>, vector<128x128xf32> -> vector<128x128xf32>
    %c0_21 = arith.constant 0 : index
    %c0_22 = arith.constant 0 : index
    %62 = memref.load %arg0[%c0_21, %c0_22] : memref<1x2xf32, #tpu.memory_space<smem>>
    %63 = vector.broadcast %62 : f32 to vector<128x128xf32>
    %64 = arith.mulf %63, %61 : vector<128x128xf32>
    %65 = arith.addf %0, %64 : vector<128x128xf32>
    %cst_23 = arith.constant dense<0.000000e+00> : vector<128x128xf32>
    %66 = tpu.matmul %60, %61, %cst_23 {dimension_numbers = #tpu.dot_dimension_numbers<[1], [0], [0], [1], [0, 0, 1, 1], [], []>} : vector<128x128xf32>, vector<128x128xf32>, vector<128x128xf32> -> vector<128x128xf32>
    %c0_24 = arith.constant 0 : index
    %c1 = arith.constant 1 : index
    %67 = memref.load %arg0[%c0_24, %c1] : memref<1x2xf32, #tpu.memory_space<smem>>
    %68 = vector.broadcast %67 : f32 to vector<128x128xf32>
    %69 = arith.mulf %68, %66 : vector<128x128xf32>
    %70 = arith.addf %65, %69 : vector<128x128xf32>
    %c0_25 = arith.constant 0 : index
    %c0_26 = arith.constant 0 : index
    %71 = vector.load %arg3[%c0_25, %c0_26] : memref<128x128xf32, #tpu.memory_space<vmem>>, vector<128x128xf32>
    %cst_27 = arith.constant dense<0.000000e+00> : vector<128x128xf32>
    %72 = tpu.matmul %70, %71, %cst_27 {dimension_numbers = #tpu.dot_dimension_numbers<[1], [0], [0], [1], [0, 0, 1, 1], [], []>} : vector<128x128xf32>, vector<128x128xf32>, vector<128x128xf32> -> vector<128x128xf32>
    %73 = vector.broadcast %2 : vector<1x128xf32> to vector<128x128xf32>
    %74 = arith.addf %72, %73 : vector<128x128xf32>
    %c0_28 = arith.constant 0 : index
    %c0_29 = arith.constant 0 : index
    %75 = vector.load %arg6[%c0_28, %c0_29] : memref<128x128xf32, #tpu.memory_space<vmem>>, vector<128x128xf32>
    tpu.vector_store %arg6[%c0_28, %c0_29], %74 {strides = array<i32>} : memref<128x128xf32, #tpu.memory_space<vmem>>, vector<128x128xf32>,
    return
  }
}

</mosaic_0001>

<bundles_post_ra>
// kernel: _gnn_layer_forward.1
= control target key start
LH: loop header
LB: loop body
LE: loop exit
PB: predicated region body
PF: predicated region fallthrough
CT: control target
= control target key end

     0   :  { %11 = vsyncpa [#allocation5], 0  ;;  %s3498_s0 = inlined_call_operand.vmem [shape: f32[1,2], index: 0, kind: input, shape index: {}]   ;;  %s3499_s1 = inlined_call_operand.vmem [shape: f32[128,128], index: 1, kind: input, shape index: {}]   ;;  %s3500_s2 = inlined_call_operand.vmem [shape: f32[128,128], index: 2, kind: input, shape index: {}]   ;;  %s3501_s3 = inlined_call_operand.vmem [shape: f32[128,128], index: 3, kind: input, shape index: {}]   ;;  %s3502_s4 = inlined_call_operand.vmem [shape: f32[1,128], index: 4, kind: input, shape index: {}]   ;;  %s3503_s5 = inlined_call_operand.vmem [shape: f32[128,128], index: 5, kind: input, shape index: {}]   ;;  %s3504_s6 = inlined_call_operand.vmem [shape: f32[128,128], index: 6, kind: output, shape index: {}]  }
   0x1   :  { %s18_s23 = sshll.u32 %s3498_s0, 4  ;;  %s19_s23 = int_to_ptr.vmem [resolvable:$true] %s18_s23 }
   0x2   :  { %s2511_s24 = scalar_lea.vmem %s19_s23, 16  ;;  %p2516_p1 = scmp.lt.s32.totalorder %s19_s23, %s19_s23 }
   0x3   :  { %p2512_p0 = scmp.ne.s32.totalorder %s19_s23, %s2511_s24  ;;  %p2517_p2 = scmp.lt.s32.totalorder %s2511_s24, %s2511_s24 }
   0x5   :  { %p2518_p3 = por %p2517_p2, %p2516_p1 }
   0x7   :  { %p2519_p4 = pnand %p2518_p3, %p2512_p0 }
   0x9   :  { %2522 = shalt.err (!%p2519_p4)
}
   0xa   :  { %s2527_s25 = smov [#allocation4]  }
   0xb   :  { %21 = dma.vmem_to_smem %s19_s23, 16, %s2527_s25, [#allocation5]  }
   0xc   :  { %2523 = dma.done.wait [#allocation5], 16  }
   0xd   :  { %2524 = vsyncadd [#allocation5], 4294967280 }
   0xe   :  { %33 = sfence }
   0xf   :  { %v2570_v0 = vld [vmem:[%s3503_s5] sm:$0xff]  ;;  %v2575_v1 = vld [vmem:[%s3503_s5 + $0x8] sm:$0xff]  ;;  %v2580_v2 = vld [vmem:[%s3503_s5 + $0x10] sm:$0xff] }
  0x10   :  { %v2585_v3 = vld [vmem:[%s3503_s5 + $0x18] sm:$0xff]  ;;  %v2590_v4 = vld [vmem:[%s3503_s5 + $0x20] sm:$0xff]  ;;  %v2595_v5 = vld [vmem:[%s3503_s5 + $0x28] sm:$0xff] }
  0x11   :  { %v2600_v6 = vld [vmem:[%s3503_s5 + $0x30] sm:$0xff]  ;;  %v2605_v7 = vld [vmem:[%s3503_s5 + $0x38] sm:$0xff]  ;;  %v2610_v8 = vld [vmem:[%s3503_s5 + $0x40] sm:$0xff] }
  0x12   :  { %v2615_v9 = vld [vmem:[%s3503_s5 + $0x48] sm:$0xff]  ;;  %v2620_v10 = vld [vmem:[%s3503_s5 + $0x50] sm:$0xff]  ;;  %v2625_v11 = vld [vmem:[%s3503_s5 + $0x58] sm:$0xff] }
  0x13   :  { %v2630_v12 = vld [vmem:[%s3503_s5 + $0x60] sm:$0xff]  ;;  %v2635_v13 = vld [vmem:[%s3503_s5 + $0x68] sm:$0xff]  ;;  %v2640_v14 = vld [vmem:[%s3503_s5 + $0x70] sm:$0xff] }
  0x14   :  { %v2645_v15 = vld [vmem:[%s3503_s5 + $0x78] sm:$0xff] }
  0x15   :  { %105 = vsyncadd [#allocation3], 2048  ;;  %v122_v16 = vld [vmem:[%s3500_s2] sm:$0xff]  ;;  %v123_v17 = vld [vmem:[%s3500_s2 + $0x8] sm:$0xff] }
  0x16   :  { %v2220_v18 = vpack.c.bf16 %v123_v17, %v122_v16  ;;  %v124_v19 = vld [vmem:[%s3500_s2 + $0x10] sm:$0xff]  ;;  %v125_v20 = vld [vmem:[%s3500_s2 + $0x18] sm:$0xff]  ;;  %v126_v22 = vld [vmem:[%s3500_s2 + $0x20] sm:$0xff] }
  0x17   :  { %v2224_v21 = vpack.c.bf16 %v125_v20, %v124_v19  ;;  %v127_v23 = vld [vmem:[%s3500_s2 + $0x28] sm:$0xff]  ;;  %v2668_v25 = vld [vmem:[%s3499_s1] sm:$0xff]  ;;  %v128_v26 = vld [vmem:[%s3500_s2 + $0x30] sm:$0xff] }
  0x18   :  { %2221 = vmatprep.subr.bf16.mxu0 %v2220_v18  ;;  %v2228_v24 = vpack.c.bf16 %v127_v23, %v126_v22  ;;  %v129_v27 = vld [vmem:[%s3500_s2 + $0x38] sm:$0xff]  ;;  %1972 = vmatprep.mubr.f32.mxu0 %v2668_v25  ;;  %v130_v29 = vld [vmem:[%s3500_s2 + $0x40] sm:$0xff]  ;;  %v131_v30 = vld [vmem:[%s3500_s2 + $0x48] sm:$0xff] }
  0x19   :  { %2223 = vmatpush3.bf16.msra.mxu0 %v2220_v18  ;;  %v2232_v28 = vpack.c.bf16 %v129_v27, %v128_v26  ;;  %v2236_v31 = vpack.c.bf16 %v131_v30, %v130_v29  ;;  %v132_v32 = vld [vmem:[%s3500_s2 + $0x50] sm:$0xff]  ;;  %v133_v33 = vld [vmem:[%s3500_s2 + $0x58] sm:$0xff]  ;;  %v134_v35 = vld [vmem:[%s3500_s2 + $0x60] sm:$0xff] }
  0x1a   :  { %2225 = vmatprep.subr.bf16.mxu0 %v2224_v21  ;;  %v2240_v34 = vpack.c.bf16 %v133_v33, %v132_v32  ;;  %v135_v36 = vld [vmem:[%s3500_s2 + $0x68] sm:$0xff]  ;;  %v136_v38 = vld [vmem:[%s3500_s2 + $0x70] sm:$0xff]  ;;  %v137_v39 = vld [vmem:[%s3500_s2 + $0x78] sm:$0xff] }
  0x1b   :  { %v2244_v37 = vpack.c.bf16 %v135_v36, %v134_v35  ;;  %v2248_v40 = vpack.c.bf16 %v137_v39, %v136_v38  ;;  %v2704_v41 = vld [vmem:[%s3499_s1 + $0x8] sm:$0xff]  ;;  %v2709_v42 = vld [vmem:[%s3499_s1 + $0x10] sm:$0xff]  ;;  %v2716_v43 = vld [vmem:[%s3499_s1 + $0x18] sm:$0xff] }
  0x1c   :  { %v2721_v44 = vld [vmem:[%s3499_s1 + $0x20] sm:$0xff]  ;;  %v2728_v45 = vld [vmem:[%s3499_s1 + $0x28] sm:$0xff]  ;;  %v2733_v46 = vld [vmem:[%s3499_s1 + $0x30] sm:$0xff] }
  0x1d   :  { %2227 = vmatpush3.bf16.msra.mxu0 %v2224_v21  ;;  %3527 = vst [vmem:[#allocation9_spill] sm:$0xff] %v2728_v45  ;;  %3528 = vst [vmem:[#allocation10_spill] sm:$0xff] %v2733_v46  ;;  %v2740_v47 = vld [vmem:[%s3499_s1 + $0x38] sm:$0xff]  ;;  %v2745_v48 = vld [vmem:[%s3499_s1 + $0x40] sm:$0xff] }
  0x1e   :  { %2229 = vmatprep.subr.bf16.mxu0 %v2228_v24  ;;  %3529 = vst [vmem:[#allocation11_spill] sm:$0xff] %v2740_v47  ;;  %3530 = vst [vmem:[#allocation12_spill] sm:$0xff] %v2745_v48  ;;  %v2752_v49 = vld [vmem:[%s3499_s1 + $0x48] sm:$0xff]  ;;  %v2757_v50 = vld [vmem:[%s3499_s1 + $0x50] sm:$0xff] }
  0x1f   :  { %3531 = vst [vmem:[#allocation13_spill] sm:$0xff] %v2752_v49  ;;  %3532 = vst [vmem:[#allocation14_spill] sm:$0xff] %v2757_v50  ;;  %v2764_v51 = vld [vmem:[%s3499_s1 + $0x58] sm:$0xff]  ;;  %v2769_v52 = vld [vmem:[%s3499_s1 + $0x60] sm:$0xff] }
  0x20   :  { %3533 = vst [vmem:[#allocation15_spill] sm:$0xff] %v2764_v51  ;;  %3534 = vst [vmem:[#allocation16_spill] sm:$0xff] %v2769_v52  ;;  %v2776_v53 = vld [vmem:[%s3499_s1 + $0x68] sm:$0xff]  ;;  %v2781_v54 = vld [vmem:[%s3499_s1 + $0x70] sm:$0xff] }
  0x21   :  { %2231 = vmatpush3.bf16.msra.mxu0 %v2228_v24  ;;  %3535 = vst [vmem:[#allocation17_spill] sm:$0xff] %v2776_v53  ;;  %3536 = vst [vmem:[#allocation18_spill] sm:$0xff] %v2781_v54  ;;  %v2788_v55 = vld [vmem:[%s3499_s1 + $0x78] sm:$0xff] }
  0x22   :  { %2233 = vmatprep.subr.bf16.mxu0 %v2232_v28  ;;  %3537 = vst [vmem:[#allocation19_spill] sm:$0xff] %v2788_v55 }
  0x25   :  { %2235 = vmatpush3.bf16.msra.mxu0 %v2232_v28 }
  0x26   :  { %2237 = vmatprep.subr.bf16.mxu0 %v2236_v31 }
  0x29   :  { %2239 = vmatpush3.bf16.msra.mxu0 %v2236_v31 }
  0x2a   :  { %2241 = vmatprep.subr.bf16.mxu0 %v2240_v34 }
  0x2d   :  { %2243 = vmatpush3.bf16.msra.mxu0 %v2240_v34 }
  0x2e   :  { %2245 = vmatprep.subr.bf16.mxu0 %v2244_v37 }
  0x31   :  { %2247 = vmatpush3.bf16.msra.mxu0 %v2244_v37 }
  0x32   :  { %2249 = vmatprep.subr.bf16.mxu0 %v2248_v40 }
  0x35   :  { %2251 = vmatpush3.bf16.msra.mxu0 %v2248_v40 }
  0x38   :  { %1973 = vmatmul.mubr.f32.vlgmr.msra.gmra.mrb[0].mxu0 %v2704_v41 }
  0x39   :  { %1975 = vmatprep.mubr.f32.mxu0 %v2709_v42 }
  0x3c   :  { %1976 = vmatmul.mubr.f32.gmra.mrb[2].mxu0 %v2716_v43 }
  0x3d   :  { %1978 = vmatprep.mubr.f32.mxu0 %v2721_v44 }
  0x40   :  { %1979 = vmatmul.mubr.f32.gmra.mrb[4].mxu0 %v2728_v45 }
  0x41   :  { %1981 = vmatprep.mubr.f32.mxu0 %v2733_v46 }
  0x44   :  { %1982 = vmatmul.mubr.f32.gmra.mrb[6].mxu0 %v2740_v47 }
  0x45   :  { %1984 = vmatprep.mubr.f32.mxu0 %v2745_v48 }
  0x48   :  { %1985 = vmatmul.mubr.f32.gmra.mrb[8].mxu0 %v2752_v49 }
  0x49   :  { %1987 = vmatprep.mubr.f32.mxu0 %v2757_v50 }
  0x4c   :  { %1988 = vmatmul.mubr.f32.gmra.mrb[10].mxu0 %v2764_v51 }
  0x4d   :  { %1990 = vmatprep.mubr.f32.mxu0 %v2769_v52 }
  0x50   :  { %1991 = vmatmul.mubr.f32.gmra.mrb[12].mxu0 %v2776_v53 }
  0x51   :  { %1993 = vmatprep.mubr.f32.mxu0 %v2781_v54 }
  0x54   :  { %1994 = vmatmul.mubr.f32.gmra.mrb[14].mxu0 %v2788_v55 }
 0x10b   :  { %v2791_v56 = vpop.f32.mrb[0].mxu0 }
 0x10c   :  { %v205_v57 = vpop.f32.mrb[1].mxu0  ;;  %v285_v58 = vmul.f32 %v2791_v56, %v2791_v56 }
 0x10d   :  { %2028 = vmatprep.mubr.f32.mxu1 %v205_v57  ;;  %v2252_v59 = vpack.c.bf16 %v2791_v56, %v205_v57  ;;  %v284_v62 = vmul.f32 %v205_v57, %v205_v57 }
 0x10e   :  { %302 = vadd.xlane.f32.xlu0 %v285_v58 }
 0x10f   :  { %v2796_v60 = vpop.f32.mrb[2].mxu0  ;;  %2253 = vmatprep.subr.bf16.mxu1 %v2252_v59 }
 0x110   :  { %v2798_v61 = vpop.f32.mrb[3].mxu0  ;;  %2255 = vmatpush3.bf16.xpose.msra.mxu1 %v2252_v59  ;;  %v287_v17 = vmul.f32 %v2796_v60, %v2796_v60 }
 0x111   :  { %v2256_v63 = vpack.c.bf16 %v2796_v60, %v2798_v61  ;;  %v286_v16 = vmul.f32 %v2798_v61, %v2798_v61 }
 0x112   :  { %300 = vadd.xlane.f32.xlu0 %v284_v62 }
 0x113   :  { %304 = vadd.xlane.f32.xlu1 %v286_v16  ;;  %2257 = vmatprep.subr.bf16.mxu1 %v2256_v63  ;;  %v1980_v18 = vpop.f32.mrb[4].mxu0 }
 0x114   :  { %v225_v19 = vpop.f32.mrb[5].mxu0  ;;  %v289_v22 = vmul.f32 %v1980_v18, %v1980_v18 }
 0x115   :  { %v2260_v20 = vpack.c.bf16 %v1980_v18, %v225_v19  ;;  %v288_v21 = vmul.f32 %v225_v19, %v225_v19 }
 0x117   :  { %306 = vadd.xlane.f32.xlu1 %v287_v17  ;;  %308 = vadd.xlane.f32.xlu0 %v288_v21  ;;  %v1983_v23 = vpop.f32.mrb[6].mxu0  ;;  %v2528_v21 = vmov 1.0  }
 0x118   :  { %2259 = vmatpush3.bf16.xpose.msra.mxu1 %v2256_v63  ;;  %v235_v24 = vpop.f32.mrb[7].mxu0  ;;  %v291_v28 = vmul.f32 %v1983_v23, %v1983_v23 }
 0x119   :  { %2261 = vmatprep.subr.bf16.mxu1 %v2260_v20  ;;  %v2264_v26 = vpack.c.bf16 %v1983_v23, %v235_v24  ;;  %v290_v27 = vmul.f32 %v235_v24, %v235_v24 }
 0x11b   :  { %310 = vadd.xlane.f32.xlu1 %v289_v22  ;;  %312 = vadd.xlane.f32.xlu0 %v290_v27  ;;  %v1986_v29 = vpop.f32.mrb[8].mxu0 }
 0x11c   :  { %v245_v30 = vpop.f32.mrb[9].mxu0  ;;  %v293_v33 = vmul.f32 %v1986_v29, %v1986_v29 }
 0x11d   :  { %v2268_v31 = vpack.c.bf16 %v1986_v29, %v245_v30  ;;  %v292_v32 = vmul.f32 %v245_v30, %v245_v30 }
 0x11f   :  { %314 = vadd.xlane.f32.xlu1 %v291_v28  ;;  %316 = vadd.xlane.f32.xlu0 %v292_v32  ;;  %v1989_v34 = vpop.f32.mrb[10].mxu0 }
 0x120   :  { %2263 = vmatpush3.bf16.xpose.msra.mxu1 %v2260_v20  ;;  %v255_v35 = vpop.f32.mrb[11].mxu0  ;;  %v295_v38 = vmul.f32 %v1989_v34, %v1989_v34 }
 0x121   :  { %2265 = vmatprep.subr.bf16.mxu1 %v2264_v26  ;;  %v2272_v36 = vpack.c.bf16 %v1989_v34, %v255_v35  ;;  %v294_v37 = vmul.f32 %v255_v35, %v255_v35 }
 0x123   :  { %318 = vadd.xlane.f32.xlu1 %v293_v33  ;;  %320 = vadd.xlane.f32.xlu0 %v294_v37  ;;  %v1992_v39 = vpop.f32.mrb[12].mxu0 }
 0x124   :  { %v265_v40 = vpop.f32.mrb[13].mxu0  ;;  %v297_v59 = vmul.f32 %v1992_v39, %v1992_v39 }
 0x125   :  { %v2276_v57 = vpack.c.bf16 %v1992_v39, %v265_v40  ;;  %v296_v58 = vmul.f32 %v265_v40, %v265_v40 }
 0x127   :  { %322 = vadd.xlane.f32.xlu1 %v295_v38  ;;  %324 = vadd.xlane.f32.xlu0 %v296_v58  ;;  %v1995_v62 = vpop.f32.mrb[14].mxu0 }
 0x128   :  { %2267 = vmatpush3.bf16.xpose.msra.mxu1 %v2264_v26  ;;  %v275_v63 = vpop.f32.mrb[15].mxu0  ;;  %v299_v20 = vmul.f32 %v1995_v62, %v1995_v62 }
 0x129   :  { %2269 = vmatprep.subr.bf16.mxu1 %v2268_v31  ;;  %v2280_v16 = vpack.c.bf16 %v1995_v62, %v275_v63  ;;  %v298_v17 = vmul.f32 %v275_v63, %v275_v63 }
 0x12b   :  { %326 = vadd.xlane.f32.xlu1 %v297_v59  ;;  %328 = vadd.xlane.f32.xlu0 %v298_v17 }
 0x12f   :  { %330 = vadd.xlane.f32.xlu1 %v299_v20 }
 0x130   :  { %2271 = vmatpush3.bf16.xpose.msra.mxu1 %v2268_v31 }
 0x131   :  { %2273 = vmatprep.subr.bf16.mxu1 %v2272_v36 }
 0x138   :  { %2275 = vmatpush3.bf16.xpose.msra.mxu1 %v2272_v36 }
 0x139   :  { %2277 = vmatprep.subr.bf16.mxu1 %v2276_v57 }
 0x140   :  { %2279 = vmatpush3.bf16.xpose.msra.mxu1 %v2276_v57 }
 0x141   :  { %2281 = vmatprep.subr.bf16.mxu1 %v2280_v16 }
 0x148   :  { %2283 = vmatpush3.bf16.xpose.msra.mxu1 %v2280_v16 }
 0x14f   :  { %2029 = vmatmul.mubr.f32.vlgmr.msra.gmra.mrb[0].mxu1 %v2791_v56 }
 0x150   :  { %2031 = vmatprep.mubr.f32.mxu1 %v2798_v61 }
 0x153   :  { %2032 = vmatmul.mubr.f32.gmra.mrb[2].mxu1 %v2796_v60 }
 0x154   :  { %2034 = vmatprep.mubr.f32.mxu1 %v225_v19 }
 0x157   :  { %2035 = vmatmul.mubr.f32.gmra.mrb[4].mxu1 %v1980_v18 }
 0x158   :  { %2037 = vmatprep.mubr.f32.mxu1 %v235_v24 }
 0x15b   :  { %2038 = vmatmul.mubr.f32.gmra.mrb[6].mxu1 %v1983_v23 }
 0x15c   :  { %2040 = vmatprep.mubr.f32.mxu1 %v245_v30 }
 0x15f   :  { %2041 = vmatmul.mubr.f32.gmra.mrb[8].mxu1 %v1986_v29 }
 0x160   :  { %2043 = vmatprep.mubr.f32.mxu1 %v255_v35 }
 0x162   :  { %834 = vxpose.xlu1.b32.start.end [1/1] (short) (narrow) %v2528_v21, 8 }
 0x163   :  { %2044 = vmatmul.mubr.f32.gmra.mrb[10].mxu1 %v1989_v34  ;;  %v509_v34 = vlaneseq }
 0x164   :  { %2046 = vmatprep.mubr.f32.mxu1 %v265_v40 }
 0x165   :  { %v510_v35 = vshrl.u32 %v509_v34, 7 }
 0x167   :  { %2047 = vmatmul.mubr.f32.gmra.mrb[12].mxu1 %v1992_v39  ;;  %v2809_v36 = vsub.s32 0, %v510_v35 }
 0x168   :  { %2049 = vmatprep.mubr.f32.mxu1 %v275_v63 }
 0x16b   :  { %2050 = vmatmul.mubr.f32.gmra.mrb[14].mxu1 %v1995_v62 }
 0x19b   :  { %v303_v22 = vpop.xlane.xlu0 %302 }
 0x19f   :  { %v301_v56 = vpop.xlane.xlu0 %300 }
 0x1a0   :  { %477 = vxpose.xlu0.b32.start [1/16] (narrow) %v301_v56, 8  ;;  %v305_v61 = vpop.xlane.xlu1 %304 }
 0x1a4   :  { %478 = vxpose.xlu0.b32.cont [2/16] (narrow) %v303_v22, 8  ;;  %v307_v60 = vpop.xlane.xlu1 %306  ;;  %v309_v18 = vpop.xlane.xlu0 %308 }
 0x1a8   :  { %479 = vxpose.xlu0.b32.cont [3/16] (narrow) %v305_v61, 8  ;;  %v311_v19 = vpop.xlane.xlu1 %310  ;;  %v313_v23 = vpop.xlane.xlu0 %312 }
 0x1ac   :  { %480 = vxpose.xlu0.b32.cont [4/16] (narrow) %v307_v60, 8  ;;  %v315_v24 = vpop.xlane.xlu1 %314  ;;  %v317_v26 = vpop.xlane.xlu0 %316 }
 0x1b0   :  { %481 = vxpose.xlu0.b32.cont [5/16] (narrow) %v309_v18, 8  ;;  %v319_v27 = vpop.xlane.xlu1 %318  ;;  %v321_v28 = vpop.xlane.xlu0 %320 }
 0x1b4   :  { %482 = vxpose.xlu0.b32.cont [6/16] (narrow) %v311_v19, 8  ;;  %v323_v29 = vpop.xlane.xlu1 %322  ;;  %v325_v30 = vpop.xlane.xlu0 %324 }
 0x1b8   :  { %483 = vxpose.xlu0.b32.cont [7/16] (narrow) %v313_v23, 8  ;;  %v327_v31 = vpop.xlane.xlu1 %326  ;;  %v329_v32 = vpop.xlane.xlu0 %328 }
 0x1bc   :  { %484 = vxpose.xlu0.b32.cont [8/16] (narrow) %v315_v24, 8  ;;  %v331_v33 = vpop.xlane.xlu1 %330 }
 0x1c0   :  { %485 = vxpose.xlu0.b32.cont [9/16] (narrow) %v317_v26, 8 }
 0x1c4   :  { %486 = vxpose.xlu0.b32.cont [10/16] (narrow) %v319_v27, 8 }
 0x1c8   :  { %487 = vxpose.xlu0.b32.cont [11/16] (narrow) %v321_v28, 8 }
 0x1cc   :  { %488 = vxpose.xlu0.b32.cont [12/16] (narrow) %v323_v29, 8 }
 0x1d0   :  { %489 = vxpose.xlu0.b32.cont [13/16] (narrow) %v325_v30, 8 }
 0x1d4   :  { %490 = vxpose.xlu0.b32.cont [14/16] (narrow) %v327_v31, 8 }
 0x1d8   :  { %491 = vxpose.xlu0.b32.cont [15/16] (narrow) %v329_v32, 8 }
 0x1dc   :  { %492 = vxpose.xlu0.b32.end [16/16] (narrow) %v331_v33, 8 }
 0x1e2   :  { %v850_v16 = vpop.trf.xlu1 }
 0x1e3   :  { %v2813_v51 = vrot.slane %v850_v16, %v2809_v36 }
 0x220   :  { %v493_v37 = vpop.trf.xlu0 }
 0x221   :  { %v512_v38 = vrot.slane %v493_v37, %v2809_v36 }
 0x222   :  { %v2030_v39 = vpop.f32.mrb[0].mxu1 }
 0x223   :  { %v514_v40 = vadd.f32 %v512_v38, %v303_v22  ;;  %v530_v57 = vmul.f32 2.0, %v2030_v39  ;;  %v398_v58 = vpop.f32.mrb[1].mxu1  ;;  %v513_v59 = vadd.f32 %v512_v38, %v301_v56  ;;  %v516_v55 = vadd.f32 %v512_v38, %v307_v60 }
 0x224   :  { %v529_v62 = vmul.f32 2.0, %v398_v58  ;;  %v515_v35 = vadd.f32 %v512_v38, %v305_v61  ;;  %v518_v39 = vadd.f32 %v512_v38, %v311_v19  ;;  %v517_v56 = vadd.f32 %v512_v38, %v309_v18 }
 0x225   :  { %v546_v63 = vsub.f32 %v514_v40, %v530_v57  ;;  %v2823_v18 = vadd.f32 %v512_v38, %v323_v29 }
 0x226   :  { %v545_v17 = vsub.f32 %v513_v59, %v529_v62  ;;  %v2033_v20 = vpop.f32.mrb[2].mxu1  ;;  %v520_v59 = vadd.f32 %v512_v38, %v315_v24  ;;  %v519_v62 = vadd.f32 %v512_v38, %v313_v23  ;;  %v2827_v24 = vadd.f32 %v512_v38, %v327_v31 }
 0x227   :  { %v562_v21 = vmax.f32 %v546_v63, 0.0  ;;  %v532_v54 = vmul.f32 2.0, %v2033_v20  ;;  %v408_v53 = vpop.f32.mrb[3].mxu1  ;;  %v521_v20 = vadd.f32 %v512_v38, %v317_v26 }
 0x228   :  { %v561_v34 = vmax.f32 %v545_v17, 0.0  ;;  %v531_v52 = vmul.f32 2.0, %v408_v53  ;;  %v522_v53 = vadd.f32 %v512_v38, %v319_v27 }
 0x229   :  { %v2815_v37 = vadd.f32 1e-10, %v562_v21  ;;  %v548_v22 = vsub.f32 %v516_v55, %v532_v54  ;;  %v2829_v21 = vadd.f32 %v512_v38, %v325_v30 }
 0x22a   :  { %v2817_v58 = vadd.f32 1e-10, %v561_v34  ;;  %v547_v40 = vsub.f32 %v515_v35, %v531_v52  ;;  %v2036_v57 = vpop.f32.mrb[4].mxu1  ;;  %v2825_v52 = vadd.f32 %v512_v38, %v321_v28  ;;  %v2831_v34 = vadd.f32 %v512_v38, %v331_v33 }
 0x22b   :  { %2383 = vrsqrt.f32 %v2815_v37  ;;  %v564_v60 = vmax.f32 %v548_v22, 0.0  ;;  %v534_v63 = vmul.f32 2.0, %v2036_v57  ;;  %v418_v61 = vpop.f32.mrb[5].mxu1  ;;  %vm602_vm0 = vcmp.eq.f32.partialorder %v2815_v37, inf }
 0x22c   :  { %2385 = vrsqrt.f32 %v2817_v58  ;;  %v563_v16 = vmax.f32 %v547_v40, 0.0  ;;  %v533_v17 = vmul.f32 2.0, %v418_v61  ;;  %v2833_v40 = vadd.f32 %v512_v38, %v329_v32 }
 0x22d   :  { %v2821_v54 = vadd.f32 1e-10, %v564_v60  ;;  %v550_v55 = vsub.f32 %v518_v39, %v534_v63  ;;  %vm595_vm1 = vcmp.eq.f32.partialorder %v2817_v58, inf  ;;  %vm597_vm2 = vcmp.eq.f32.partialorder %v2817_v58, 0.0 }
 0x22e   :  { %v549_v19 = vsub.f32 %v517_v56, %v533_v17  ;;  %v2039_v23 = vpop.f32.mrb[6].mxu1  ;;  %v2837_v26 = vadd.f32 1e-10, %v563_v16  ;;  %v598_v38 = vand.u32 2147483648, %v2817_v58  ;;  %vm604_vm3 = vcmp.eq.f32.partialorder %v2815_v37, 0.0 }
 0x22f   :  { %v566_v27 = vmax.f32 %v550_v55, 0.0  ;;  %v536_v35 = vmul.f32 2.0, %v2039_v23  ;;  %v428_v22 = vpop.f32.mrb[7].mxu1  ;;  %2387 = vrsqrt.f32 %v2821_v54  ;;  %v605_v63 = vand.u32 2147483648, %v2815_v37 }
 0x230   :  { %v565_v28 = vmax.f32 %v549_v19, 0.0  ;;  %v535_v29 = vmul.f32 2.0, %v428_v22  ;;  %v619_v16 = vand.u32 2147483648, %v2821_v54  ;;  %v612_v19 = vand.u32 2147483648, %v2837_v26 }
 0x231   :  { %v2839_v39 = vadd.f32 1e-10, %v566_v27  ;;  %v552_v31 = vsub.f32 %v520_v59, %v536_v35  ;;  %vm616_vm4 = vcmp.eq.f32.partialorder %v2821_v54, inf  ;;  %vm618_vm5 = vcmp.eq.f32.partialorder %v2821_v54, 0.0 }
 0x232   :  { %v2843_v30 = vadd.f32 1e-10, %v565_v28  ;;  %v551_v33 = vsub.f32 %v519_v62, %v535_v29  ;;  %v2042_v32 = vpop.f32.mrb[8].mxu1  ;;  %vm609_vm8 = vcmp.eq.f32.partialorder %v2837_v26, inf  ;;  %vm611_vm9 = vcmp.eq.f32.partialorder %v2837_v26, 0.0 }
 0x233   :  { %2389 = vrsqrt.f32 %v2839_v39  ;;  %v568_v56 = vmax.f32 %v552_v31, 0.0  ;;  %v538_v57 = vmul.f32 2.0, %v2042_v32  ;;  %v438_v60 = vpop.f32.mrb[9].mxu1  ;;  %v633_v29 = vand.u32 2147483648, %v2839_v39 }
 0x234   :  { %2391 = vrsqrt.f32 %v2837_v26  ;;  %v567_v59 = vmax.f32 %v551_v33, 0.0  ;;  %v537_v61 = vmul.f32 2.0, %v438_v60  ;;  %vm630_vm6 = vcmp.eq.f32.partialorder %v2839_v39, inf }
 0x235   :  { %v2384_v17 = vpop.eup %2383  ;;  %2393 = vrsqrt.f32 %v2843_v30  ;;  %v2852_v62 = vadd.f32 1e-10, %v568_v56  ;;  %v554_v55 = vsub.f32 %v522_v53, %v538_v57  ;;  %vm632_vm7 = vcmp.eq.f32.partialorder %v2839_v39, 0.0 }
 0x236   :  { %v2386_v23 = vpop.eup %2385  ;;  %v2855_v27 = vadd.f32 1e-10, %v567_v59  ;;  %v553_v35 = vsub.f32 %v521_v20, %v537_v61  ;;  %v2045_v22 = vpop.f32.mrb[10].mxu1  ;;  %v601_v28 = vmul.f32 %v2384_v17, %v2815_v37  ;;  %vm623_vm10 = vcmp.eq.f32.partialorder %v2843_v30, inf }
 0x237   :  { %2395 = vrsqrt.f32 %v2852_v62  ;;  %v570_v31 = vmax.f32 %v554_v55, 0.0  ;;  %v540_v33 = vmul.f32 2.0, %v2045_v22  ;;  %v448_v32 = vpop.f32.mrb[11].mxu1  ;;  %v594_v53 = vmul.f32 %v2386_v23, %v2817_v58 }
 0x238   :  { %2397 = vrsqrt.f32 %v2855_v27  ;;  %v569_v56 = vmax.f32 %v553_v35, 0.0  ;;  %v539_v20 = vmul.f32 2.0, %v448_v32  ;;  %v603_v57 = vsel %vm602_vm0, %v2815_v37, %v601_v28 }
 0x239   :  { %v2867_v60 = vadd.f32 1e-10, %v570_v31  ;;  %v556_v59 = vsub.f32 %v2823_v18, %v540_v33  ;;  %v596_v61 = vsel %vm595_vm1, %v2817_v58, %v594_v53  ;;  %v606_v17 = vsel %vm604_vm3, %v605_v63, %v603_v57  ;;  %v2388_v55 = vpop.eup %2387 }
 0x23a   :  { %v2876_v23 = vadd.f32 1e-10, %v569_v56  ;;  %v555_v35 = vsub.f32 %v2825_v52, %v539_v20  ;;  %v2048_v22 = vpop.f32.mrb[12].mxu1  ;;  %v599_v28 = vsel %vm597_vm2, %v598_v38, %v596_v61  ;;  %v706_v31 = vmul.f32 -0.5, %v606_v17 }
 0x23b   :  { %2399 = vrsqrt.f32 %v2867_v60  ;;  %v572_v18 = vmax.f32 %v556_v59, 0.0  ;;  %v542_v33 = vmul.f32 2.0, %v2048_v22  ;;  %v458_v37 = vpop.f32.mrb[13].mxu1  ;;  %v705_v63 = vmul.f32 -0.5, %v599_v28 }
 0x23c   :  { %2401 = vrsqrt.f32 %v2876_v23  ;;  %v571_v32 = vmax.f32 %v555_v35, 0.0  ;;  %v541_v53 = vmul.f32 2.0, %v458_v37  ;;  %v723_v52 = vmul.f32 1.442695, %v706_v31 }
 0x23d   :  { %v2390_v58 = vpop.eup %2389  ;;  %v2886_v38 = vadd.f32 1e-10, %v572_v18  ;;  %v558_v56 = vsub.f32 %v2827_v24, %v542_v33  ;;  %v721_v20 = vmul.f32 1.442695, %v705_v63  ;;  %v615_v57 = vmul.f32 %v2388_v55, %v2821_v54 }
 0x23e   :  { %v2392_v59 = vpop.eup %2391  ;;  %v557_v61 = vsub.f32 %v2829_v21, %v541_v53  ;;  %v2051_v17 = vpop.f32.mrb[14].mxu1  ;;  %2403 = vpow2.f32 %v723_v52  ;;  %v629_v22 = vmul.f32 %v2390_v58, %v2839_v39  ;;  %v2893_v28 = vadd.f32 1e-10, %v571_v32 }
 0x23f   :  { %v2394_v35 = vpop.eup %2393  ;;  %v574_v31 = vmax.f32 %v558_v56, 0.0  ;;  %v544_v18 = vmul.f32 2.0, %v2051_v17  ;;  %v468_v37 = vpop.f32.mrb[15].mxu1  ;;  %v617_v24 = vsel %vm616_vm4, %v2821_v54, %v615_v57  ;;  %vm625_vm11 = vcmp.eq.f32.partialorder %v2843_v30, 0.0 }
 0x240   :  { %2405 = vrsqrt.f32 %v2886_v38  ;;  %v573_v21 = vmax.f32 %v557_v61, 0.0  ;;  %v543_v55 = vmul.f32 2.0, %v468_v37  ;;  %v620_v33 = vsel %vm618_vm5, %v619_v16, %v617_v24 }
 0x241   :  { %v2396_v63 = vpop.eup %2395  ;;  %v2904_v32 = vadd.f32 1e-10, %v574_v31  ;;  %v560_v53 = vsub.f32 %v2831_v34, %v544_v18  ;;  %2407 = vpow2.f32 %v721_v20  ;;  %v708_v52 = vmul.f32 -0.5, %v620_v33 }
 0x242   :  { %v2398_v58 = vpop.eup %2397  ;;  %v2907_v56 = vadd.f32 1e-10, %v573_v21  ;;  %v559_v57 = vsub.f32 %v2833_v40, %v543_v55  ;;  %v631_v61 = vsel %vm630_vm6, %v2839_v39, %v629_v22  ;;  %v608_v17 = vmul.f32 %v2392_v59, %v2837_v26 }
 0x243   :  { %2409 = vrsqrt.f32 %v2893_v28  ;;  %v576_v54 = vmax.f32 %v560_v53, 0.0  ;;  %v727_v16 = vmul.f32 1.442695, %v708_v52  ;;  %v634_v34 = vsel %vm632_vm7, %v633_v29, %v631_v61 }
 0x244   :  { %2411 = vrsqrt.f32 %v2904_v32  ;;  %v575_v20 = vmax.f32 %v559_v57, 0.0  ;;  %v710_v31 = vmul.f32 -0.5, %v634_v34  ;;  %v610_v40 = vsel %vm609_vm8, %v2837_v26, %v608_v17 }
 0x245   :  { %v2400_v22 = vpop.eup %2399  ;;  %v2923_v18 = vadd.f32 1e-10, %v576_v54  ;;  %2413 = vpow2.f32 %v727_v16  ;;  %v613_v59 = vsel %vm611_vm9, %v612_v19, %v610_v40  ;;  %v622_v39 = vmul.f32 %v2394_v35, %v2843_v30 }
 0x246   :  { %v2402_v29 = vpop.eup %2401  ;;  %2415 = vrsqrt.f32 %v2907_v56  ;;  %v731_v37 = vmul.f32 1.442695, %v710_v31  ;;  %v707_v24 = vmul.f32 -0.5, %v613_v59  ;;  %v626_v21 = vand.u32 2147483648, %v2843_v30 }
 0x247   :  { %2417 = vrsqrt.f32 %v2923_v18  ;;  %v2933_v55 = vadd.f32 1e-10, %v575_v20  ;;  %v624_v33 = vsel %vm623_vm10, %v2843_v30, %v622_v39  ;;  %v643_v26 = vmul.f32 %v2396_v63, %v2852_v62 }
 0x248   :  { %v2404_v19 = vpop.eup %2403  ;;  %v725_v53 = vmul.f32 1.442695, %v707_v24  ;;  %v627_v35 = vsel %vm625_vm11, %v626_v21, %v624_v33  ;;  %vm644_vm12 = vcmp.eq.f32.partialorder %v2852_v62, inf  ;;  %vm646_vm13 = vcmp.eq.f32.partialorder %v2852_v62, 0.0 }
 0x249   :  { %v819_v52 = vmul.f32 0.0, %v2404_v19  ;;  %2419 = vpow2.f32 %v731_v37  ;;  %v709_v57 = vmul.f32 -0.5, %v627_v35  ;;  %v645_v61 = vsel %vm644_vm12, %v2852_v62, %v643_v26 }
 0x24a   :  { %v2406_v17 = vpop.eup %2405  ;;  %2421 = vpow2.f32 %v725_v53  ;;  %v647_v54 = vand.u32 2147483648, %v2852_v62  ;;  %v636_v63 = vmul.f32 %v2398_v58, %v2855_v27  ;;  %vm637_vm14 = vcmp.eq.f32.partialorder %v2855_v27, inf }
 0x24b   :  { %v2408_v16 = vpop.eup %2407  ;;  %v2948_v30 = vmul.f32 %v2813_v51, %v819_v52  ;;  %v729_v34 = vmul.f32 1.442695, %v709_v57  ;;  %vm639_vm15 = vcmp.eq.f32.partialorder %v2855_v27, 0.0  ;;  %v640_v20 = vand.u32 2147483648, %v2855_v27 }
 0x24c   :  { %v2953_v31 = vmul.f32 %v2408_v16, %v2813_v51  ;;  %v648_v40 = vsel %vm646_vm13, %v647_v54, %v645_v61  ;;  %v638_v59 = vsel %vm637_vm14, %v2855_v27, %v636_v63  ;;  %v657_v58 = vmul.f32 %v2400_v22, %v2867_v60 }
 0x24d   :  { %v2410_v39 = vpop.eup %2409  ;;  %2423 = vpow2.f32 %v729_v34  ;;  %v712_v37 = vmul.f32 -0.5, %v648_v40  ;;  %v641_v24 = vsel %vm639_vm15, %v640_v20, %v638_v59  ;;  %vm658_vm0 = vcmp.eq.f32.partialorder %v2867_v60, inf }
 0x24e   :  { %v2412_v21 = vpop.eup %2411  ;;  %886 = vadd.xlane.f32.xlu1 %v2953_v31  ;;  %v711_v33 = vmul.f32 -0.5, %v641_v24  ;;  %v659_v26 = vsel %vm658_vm0, %v2867_v60, %v657_v58  ;;  %vm660_vm1 = vcmp.eq.f32.partialorder %v2867_v60, 0.0  ;;  %v661_v62 = vand.u32 2147483648, %v2867_v60 }
 0x24f   :  { %v2414_v19 = vpop.eup %2413  ;;  %v735_v27 = vmul.f32 1.442695, %v712_v37  ;;  %v650_v22 = vmul.f32 %v2402_v29, %v2876_v23  ;;  %vm651_vm2 = vcmp.eq.f32.partialorder %v2876_v23, inf  ;;  %vm653_vm3 = vcmp.eq.f32.partialorder %v2876_v23, 0.0 }
 0x250   :  { %v2416_v53 = vpop.eup %2415  ;;  %v821_v35 = vmul.f32 0.0, %v2414_v19  ;;  %v733_v52 = vmul.f32 1.442695, %v711_v33  ;;  %v662_v57 = vsel %vm660_vm1, %v661_v62, %v659_v26  ;;  %v654_v61 = vand.u32 2147483648, %v2876_v23 }
 0x251   :  { %v2418_v54 = vpop.eup %2417  ;;  %2425 = vpow2.f32 %v735_v27  ;;  %v714_v63 = vmul.f32 -0.5, %v662_v57  ;;  %v652_v16 = vsel %vm651_vm2, %v2876_v23, %v650_v22  ;;  %v671_v60 = vmul.f32 %v2406_v17, %v2886_v38 }
 0x252   :  { %2427 = vrsqrt.f32 %v2933_v55  ;;  %888 = vadd.xlane.f32.xlu1 %v2948_v30  ;;  %v655_v29 = vsel %vm653_vm3, %v654_v61, %v652_v16  ;;  %vm672_vm4 = vcmp.eq.f32.partialorder %v2886_v38, inf  ;;  %v2975_v37 = vmul.f32 %v2813_v51, %v821_v35 }
 0x253   :  { %v2420_v34 = vpop.eup %2419  ;;  %2429 = vpow2.f32 %v733_v52  ;;  %v739_v20 = vmul.f32 1.442695, %v714_v63  ;;  %v713_v40 = vmul.f32 -0.5, %v655_v29  ;;  %v673_v59 = vsel %vm672_vm4, %v2886_v38, %v671_v60 }
 0x254   :  { %v2422_v58 = vpop.eup %2421  ;;  %v823_v23 = vmul.f32 0.0, %v2420_v34  ;;  %v675_v17 = vand.u32 2147483648, %v2886_v38  ;;  %v664_v24 = vmul.f32 %v2410_v39, %v2893_v28  ;;  %vm674_vm5 = vcmp.eq.f32.partialorder %v2886_v38, 0.0 }
 0x255   :  { %v820_v33 = vmul.f32 0.0, %v2422_v58  ;;  %2431 = vpow2.f32 %v739_v20  ;;  %vm665_vm6 = vcmp.eq.f32.partialorder %v2893_v28, inf  ;;  %v668_v27 = vand.u32 2147483648, %v2893_v28 }
 0x256   :  { %892 = vadd.xlane.f32.xlu1 %v2975_v37  ;;  %v2983_v26 = vmul.f32 %v2813_v51, %v823_v23  ;;  %v676_v62 = vsel %vm674_vm5, %v675_v17, %v673_v59  ;;  %v666_v19 = vsel %vm665_vm6, %v2893_v28, %v664_v24  ;;  %v737_v35 = vmul.f32 1.442695, %v713_v40 }
 0x257   :  { %v2424_v22 = vpop.eup %2423  ;;  %v716_v52 = vmul.f32 -0.5, %v676_v62  ;;  %vm667_vm7 = vcmp.eq.f32.partialorder %v2893_v28, 0.0  ;;  %v685_v39 = vmul.f32 %v2412_v21, %v2904_v32  ;;  %v2991_v38 = vmul.f32 %v2813_v51, %v820_v33 }
 0x258   :  { %896 = vadd.xlane.f32.xlu0 %v2983_v26  ;;  %v822_v57 = vmul.f32 0.0, %v2424_v22  ;;  %v669_v61 = vsel %vm667_vm7, %v668_v27, %v666_v19  ;;  %vm686_vm8 = vcmp.eq.f32.partialorder %v2904_v32, inf  ;;  %v689_v16 = vand.u32 2147483648, %v2904_v32 }
 0x259   :  { %v687_v63 = vsel %vm686_vm8, %v2904_v32, %v685_v39  ;;  %v678_v60 = vmul.f32 %v2416_v53, %v2907_v56  ;;  %2433 = vpow2.f32 %v737_v35  ;;  %v743_v21 = vmul.f32 1.442695, %v716_v52 }
 0x25a   :  { %890 = vadd.xlane.f32.xlu1 %v2991_v38  ;;  %v715_v29 = vmul.f32 -0.5, %v669_v61  ;;  %vm688_vm9 = vcmp.eq.f32.partialorder %v2904_v32, 0.0  ;;  %v3000_v20 = vmul.f32 %v2813_v51, %v822_v57  ;;  %vm679_vm10 = vcmp.eq.f32.partialorder %v2907_v56, inf }
 0x25b   :  { %v2426_v28 = vpop.eup %2425  ;;  %v690_v59 = vsel %vm688_vm9, %v689_v16, %v687_v63  ;;  %v680_v23 = vsel %vm679_vm10, %v2907_v56, %v678_v60  ;;  %v699_v17 = vmul.f32 %v2418_v54, %v2923_v18  ;;  %v682_v53 = vand.u32 2147483648, %v2907_v56 }
 0x25c   :  { %v2428_v34 = vpop.eup %2427  ;;  %v825_v40 = vmul.f32 0.0, %v2426_v28  ;;  %2435 = vpow2.f32 %v743_v21  ;;  %v741_v32 = vmul.f32 1.442695, %v715_v29  ;;  %v718_v33 = vmul.f32 -0.5, %v690_v59 }
 0x25d   :  { %v2430_v58 = vpop.eup %2429  ;;  %vm681_vm11 = vcmp.eq.f32.partialorder %v2907_v56, 0.0  ;;  %vm700_vm12 = vcmp.eq.f32.partialorder %v2923_v18, inf  ;;  %v692_v54 = vmul.f32 %v2428_v34, %v2933_v55  ;;  %v703_v35 = vand.u32 2147483648, %v2923_v18 }
 0x25e   :  { %894 = vadd.xlane.f32.xlu1 %v3000_v20  ;;  %v3009_v62 = vmul.f32 %v2813_v51, %v825_v40  ;;  %v824_v19 = vmul.f32 0.0, %v2430_v58  ;;  %v683_v27 = vsel %vm681_vm11, %v682_v53, %v680_v23  ;;  %v701_v22 = vsel %vm700_vm12, %v2923_v18, %v699_v17 }
 0x25f   :  { %v2432_v24 = vpop.eup %2431  ;;  %2437 = vpow2.f32 %v741_v32  ;;  %v747_v52 = vmul.f32 1.442695, %v718_v33  ;;  %v717_v39 = vmul.f32 -0.5, %v683_v27  ;;  %vm702_vm13 = vcmp.eq.f32.partialorder %v2923_v18, 0.0 }
 0x260   :  { %v3018_v56 = vmul.f32 %v2813_v51, %v824_v19  ;;  %v827_v57 = vmul.f32 0.0, %v2432_v24  ;;  %v704_v61 = vsel %vm702_vm13, %v703_v35, %v701_v22  ;;  %vm693_vm14 = vcmp.eq.f32.partialorder %v2933_v55, inf }
 0x261   :  { %v694_v16 = vsel %vm693_vm14, %v2933_v55, %v692_v54  ;;  %v696_v60 = vand.u32 2147483648, %v2933_v55  ;;  %2439 = vpow2.f32 %v747_v52  ;;  %v745_v28 = vmul.f32 1.442695, %v717_v39 }
 0x262   :  { %900 = vadd.xlane.f32.xlu1 %v3009_v62  ;;  %v720_v21 = vmul.f32 -0.5, %v704_v61  ;;  %vm695_vm15 = vcmp.eq.f32.partialorder %v2933_v55, 0.0  ;;  %v3026_v18 = vmul.f32 %v2813_v51, %v827_v57 }
 0x263   :  { %v2434_v63 = vpop.eup %2433  ;;  %v697_v34 = vsel %vm695_vm15, %v696_v60, %v694_v16  ;;  %2441 = vpow2.f32 %v745_v28 }
 0x264   :  { %v826_v29 = vmul.f32 0.0, %v2434_v63  ;;  %v751_v59 = vmul.f32 1.442695, %v720_v21  ;;  %v719_v58 = vmul.f32 -0.5, %v697_v34 }
 0x266   :  { %898 = vadd.xlane.f32.xlu1 %v3018_v56  ;;  %v2436_v40 = vpop.eup %2435  ;;  %v3030_v23 = vmul.f32 %v2813_v51, %v826_v29  ;;  %2443 = vpow2.f32 %v751_v59  ;;  %v749_v55 = vmul.f32 1.442695, %v719_v58 }
 0x267   :  { %v829_v17 = vmul.f32 0.0, %v2436_v40 }
 0x268   :  { %2445 = vpow2.f32 %v749_v55 }
 0x269   :  { %v2438_v53 = vpop.eup %2437  ;;  %v3034_v24 = vmul.f32 %v2813_v51, %v829_v17 }
 0x26a   :  { %904 = vadd.xlane.f32.xlu1 %v3026_v18  ;;  %v828_v32 = vmul.f32 0.0, %v2438_v53 }
 0x26b   :  { %v2440_v33 = vpop.eup %2439 }
 0x26c   :  { %v3038_v19 = vmul.f32 %v2813_v51, %v828_v32  ;;  %v831_v27 = vmul.f32 0.0, %v2440_v33 }
 0x26d   :  { %v2442_v22 = vpop.eup %2441 }
 0x26e   :  { %902 = vadd.xlane.f32.xlu1 %v3030_v23  ;;  %v3042_v54 = vmul.f32 %v2813_v51, %v831_v27  ;;  %v830_v35 = vmul.f32 0.0, %v2442_v22 }
 0x270   :  { %v2444_v52 = vpop.eup %2443  ;;  %v3046_v39 = vmul.f32 %v2813_v51, %v830_v35 }
 0x271   :  { %v833_v57 = vmul.f32 0.0, %v2444_v52 }
 0x272   :  { %908 = vadd.xlane.f32.xlu1 %v3034_v24  ;;  %v2446_v61 = vpop.eup %2445 }
 0x273   :  { %v3050_v63 = vmul.f32 %v2813_v51, %v833_v57  ;;  %v832_v16 = vmul.f32 0.0, %v2446_v61 }
 0x275   :  { %v3054_v60 = vmul.f32 %v2813_v51, %v832_v16 }
 0x276   :  { %906 = vadd.xlane.f32.xlu1 %v3038_v19 }
 0x27a   :  { %912 = vadd.xlane.f32.xlu1 %v3042_v54 }
 0x27e   :  { %910 = vadd.xlane.f32.xlu1 %v3046_v39 }
 0x282   :  { %916 = vadd.xlane.f32.xlu1 %v3050_v63 }
 0x286   :  { %914 = vadd.xlane.f32.xlu1 %v3054_v60 }
 0x2db   :  { %v887_v28 = vpop.xlane.xlu1 %886 }
 0x2dc   :  { %2447 = vrsqrt.f32 %v887_v28  ;;  %vm918_vm0 = vcmp.gt.f32.partialorder %v887_v28, 0.0 }
 0x2df   :  { %v889_v21 = vpop.xlane.xlu1 %888 }
 0x2e0   :  { %2449 = vrsqrt.f32 %v889_v21  ;;  %vm919_vm1 = vcmp.gt.f32.partialorder %v889_v21, 0.0 }
 0x2e3   :  { %v893_v29 = vpop.xlane.xlu1 %892 }
 0x2e4   :  { %vm921_vm3 = vcmp.gt.f32.partialorder %v893_v29, 0.0 }
 0x2e5   :  { %v897_v53 = vpop.xlane.xlu0 %896 }
 0x2e6   :  { %v2448_v34 = vpop.eup %2447  ;;  %vm923_vm5 = vcmp.gt.f32.partialorder %v897_v53, 0.0 }
 0x2e7   :  { %v891_v40 = vpop.xlane.xlu1 %890  ;;  %v3057_v59 = vsel %vm918_vm0, %v2448_v34, 0.0 }
 0x2e8   :  { %2451 = vrsqrt.f32 %v891_v40  ;;  %982 = vxpose.xlu1.b32.start [1/16] (narrow) %v3057_v59, 8  ;;  %vm920_vm2 = vcmp.gt.f32.partialorder %v891_v40, 0.0 }
 0x2e9   :  { %2453 = vrsqrt.f32 %v893_v29 }
 0x2ea   :  { %v2450_v58 = vpop.eup %2449 }
 0x2eb   :  { %v3060_v51 = vsel %vm919_vm1, %v2450_v58, 0.0  ;;  %v895_v17 = vpop.xlane.xlu1 %894 }
 0x2ec   :  { %983 = vxpose.xlu1.b32.cont [2/16] (narrow) %v3060_v51, 8  ;;  %2455 = vrsqrt.f32 %v895_v17  ;;  %vm922_vm4 = vcmp.gt.f32.partialorder %v895_v17, 0.0 }
 0x2ed   :  { %2457 = vrsqrt.f32 %v897_v53 }
 0x2ef   :  { %v901_v55 = vpop.xlane.xlu1 %900 }
 0x2f0   :  { %vm925_vm7 = vcmp.gt.f32.partialorder %v901_v55, 0.0 }
 0x2f2   :  { %v2452_v32 = vpop.eup %2451 }
 0x2f3   :  { %v3063_v33 = vsel %vm920_vm2, %v2452_v32, 0.0  ;;  %v899_v27 = vpop.xlane.xlu1 %898  ;;  %v2454_v22 = vpop.eup %2453 }
 0x2f4   :  { %984 = vxpose.xlu1.b32.cont [3/16] (narrow) %v3063_v33, 8  ;;  %2459 = vrsqrt.f32 %v899_v27  ;;  %v3066_v35 = vsel %vm921_vm3, %v2454_v22, 0.0  ;;  %vm924_vm6 = vcmp.gt.f32.partialorder %v899_v27, 0.0 }
 0x2f5   :  { %2461 = vrsqrt.f32 %v901_v55 }
 0x2f6   :  { %v2456_v57 = vpop.eup %2455 }
 0x2f7   :  { %v905_v52 = vpop.xlane.xlu1 %904  ;;  %v3069_v61 = vsel %vm922_vm4, %v2456_v57, 0.0  ;;  %v2458_v28 = vpop.eup %2457 }
 0x2f8   :  { %985 = vxpose.xlu1.b32.cont [4/16] (narrow) %v3066_v35, 8  ;;  %v955_v21 = vsel %vm923_vm5, %v2458_v28, 0.0  ;;  %vm927_vm9 = vcmp.gt.f32.partialorder %v905_v52, 0.0 }
 0x2fb   :  { %v903_v16 = vpop.xlane.xlu1 %902 }
 0x2fc   :  { %986 = vxpose.xlu1.b32.cont [5/16] (narrow) %v3069_v61, 8  ;;  %2463 = vrsqrt.f32 %v903_v16  ;;  %vm926_vm8 = vcmp.gt.f32.partialorder %v903_v16, 0.0 }
 0x2fd   :  { %2465 = vrsqrt.f32 %v905_v52 }
 0x2fe   :  { %v2460_v29 = vpop.eup %2459 }
 0x2ff   :  { %v909_v34 = vpop.xlane.xlu1 %908  ;;  %v956_v40 = vsel %vm924_vm6, %v2460_v29, 0.0  ;;  %v2462_v32 = vpop.eup %2461 }
 0x300   :  { %987 = vxpose.xlu1.b32.cont [6/16] (narrow) %v955_v21, 8  ;;  %v957_v17 = vsel %vm925_vm7, %v2462_v32, 0.0  ;;  %vm929_vm11 = vcmp.gt.f32.partialorder %v909_v34, 0.0 }
 0x303   :  { %v907_v58 = vpop.xlane.xlu1 %906 }
 0x304   :  { %988 = vxpose.xlu1.b32.cont [7/16] (narrow) %v956_v40, 8  ;;  %2467 = vrsqrt.f32 %v907_v58  ;;  %vm928_vm10 = vcmp.gt.f32.partialorder %v907_v58, 0.0 }
 0x305   :  { %2469 = vrsqrt.f32 %v909_v34  ;;  %v966_v34 = vmul.f32 %v3057_v59, %v2953_v31 }
 0x306   :  { %v2464_v57 = vpop.eup %2463 }
 0x307   :  { %v913_v22 = vpop.xlane.xlu1 %912  ;;  %v958_v53 = vsel %vm926_vm8, %v2464_v57, 0.0  ;;  %v2466_v28 = vpop.eup %2465 }
 0x308   :  { %989 = vxpose.xlu1.b32.cont [8/16] (narrow) %v957_v17, 8  ;;  %v959_v27 = vsel %vm927_vm9, %v2466_v28, 0.0  ;;  %vm931_vm13 = vcmp.gt.f32.partialorder %v913_v22, 0.0 }
 0x309   :  { %v975_v31 = vmul.f32 %v959_v27, %v3026_v18 }
 0x30b   :  { %v911_v50 = vpop.xlane.xlu1 %910 }
 0x30c   :  { %990 = vxpose.xlu1.b32.cont [9/16] (narrow) %v958_v53, 8  ;;  %2471 = vrsqrt.f32 %v911_v50  ;;  %vm930_vm12 = vcmp.gt.f32.partialorder %v911_v50, 0.0  ;;  %v967_v50 = vmul.f32 %v3060_v51, %v2948_v30  ;;  %v974_v30 = vmul.f32 %v958_v53, %v3030_v23 }
 0x30d   :  { %2473 = vrsqrt.f32 %v913_v22  ;;  %v971_v22 = vmul.f32 %v955_v21, %v2983_v26 }
 0x30e   :  { %v2468_v29 = vpop.eup %2467 }
 0x30f   :  { %v917_v49 = vpop.xlane.xlu1 %916  ;;  %v960_v55 = vsel %vm928_vm10, %v2468_v29, 0.0  ;;  %v2470_v32 = vpop.eup %2469 }
 0x310   :  { %991 = vxpose.xlu1.b32.cont [10/16] (narrow) %v959_v27, 8  ;;  %v961_v16 = vsel %vm929_vm11, %v2470_v32, 0.0  ;;  %vm933_vm15 = vcmp.gt.f32.partialorder %v917_v49, 0.0  ;;  %v972_v32 = vmul.f32 %v956_v40, %v3018_v56 }
 0x311   :  { %v977_v51 = vmul.f32 %v961_v16, %v3034_v24 }
 0x313   :  { %v915_v48 = vpop.xlane.xlu1 %914 }
 0x314   :  { %992 = vxpose.xlu1.b32.cont [11/16] (narrow) %v960_v55, 8  ;;  %2475 = vrsqrt.f32 %v915_v48  ;;  %vm932_vm14 = vcmp.gt.f32.partialorder %v915_v48, 0.0  ;;  %v968_v48 = vmul.f32 %v3063_v33, %v2991_v38 }
 0x315   :  { %2477 = vrsqrt.f32 %v917_v49  ;;  %v973_v49 = vmul.f32 %v957_v17, %v3009_v62 }
 0x316   :  { %v2472_v47 = vpop.eup %2471 }
 0x317   :  { %v962_v57 = vsel %vm930_vm12, %v2472_v47, 0.0  ;;  %v2474_v52 = vpop.eup %2473  ;;  %v969_v47 = vmul.f32 %v3066_v35, %v2975_v37  ;;  %v976_v37 = vmul.f32 %v960_v55, %v3038_v19 }
 0x318   :  { %993 = vxpose.xlu1.b32.cont [12/16] (narrow) %v961_v16, 8  ;;  %v963_v28 = vsel %vm931_vm13, %v2474_v52, 0.0  ;;  %v978_v33 = vmul.f32 %v962_v57, %v3046_v39 }
 0x319   :  { %v979_v38 = vmul.f32 %v963_v28, %v3042_v54 }
 0x31c   :  { %994 = vxpose.xlu1.b32.cont [13/16] (narrow) %v962_v57, 8 }
 0x31e   :  { %v2476_v46 = vpop.eup %2475 }
 0x31f   :  { %v964_v58 = vsel %vm932_vm14, %v2476_v46, 0.0  ;;  %v2478_v29 = vpop.eup %2477  ;;  %v970_v46 = vmul.f32 %v3069_v61, %v3000_v20 }
 0x320   :  { %995 = vxpose.xlu1.b32.cont [14/16] (narrow) %v963_v28, 8  ;;  %v965_v45 = vsel %vm933_vm15, %v2478_v29, 0.0  ;;  %v980_v62 = vmul.f32 %v964_v58, %v3054_v60 }
 0x321   :  { %v981_v20 = vmul.f32 %v965_v45, %v3050_v63 }
 0x324   :  { %996 = vxpose.xlu1.b32.cont [15/16] (narrow) %v964_v58, 8 }
 0x328   :  { %997 = vxpose.xlu1.b32.end [16/16] (narrow) %v965_v45, 8 }
 0x36c   :  { %v998_v59 = vpop.trf.xlu1 }
 0x36d   :  { %v1017_v26 = vrot.slane %v998_v59, %v2809_v36 }
 0x36f   :  { %v1018_v56 = vmul.f32 %v1017_v26, %v966_v34  ;;  %v1019_v35 = vmul.f32 %v1017_v26, %v967_v50  ;;  %v1020_v18 = vmul.f32 %v1017_v26, %v968_v48  ;;  %v1021_v61 = vmul.f32 %v1017_v26, %v969_v47 }
 0x370   :  { %v1022_v21 = vmul.f32 %v1017_v26, %v970_v46  ;;  %v1023_v23 = vmul.f32 %v1017_v26, %v971_v22  ;;  %v1024_v40 = vmul.f32 %v1017_v26, %v972_v32  ;;  %v1025_v24 = vmul.f32 %v1017_v26, %v973_v49 }
 0x371   :  { %v1026_v17 = vmul.f32 %v1017_v26, %v974_v30  ;;  %v1027_v19 = vmul.f32 %v1017_v26, %v975_v31  ;;  %v1028_v53 = vmul.f32 %v1017_v26, %v976_v37  ;;  %v1029_v27 = vmul.f32 %v1017_v26, %v977_v51 }
 0x372   :  { %v1030_v55 = vmul.f32 %v1017_v26, %v978_v33  ;;  %v1031_v54 = vmul.f32 %v1017_v26, %v979_v38  ;;  %v1032_v16 = vmul.f32 %v1017_v26, %v980_v62  ;;  %v1033_v39 = vmul.f32 %v1017_v26, %v981_v20 }
 0x373   :  { %v3095_v45 = vadd.f32 %v1020_v18, %v2580_v2  ;;  %v3098_v63 = vadd.f32 %v1018_v56, %v2570_v0 }
 0x374   :  { %2525 = dma.done.wait [#allocation3], 2048 }
 0x375   :  { %2526 = vsyncadd [#allocation3], 4294965248  ;;  %1073 = vadd.xlane.f32.xlu1 %v3095_v45  ;;  %1069 = vadd.xlane.f32.xlu0 %v3098_v63  ;;  %v3103_v60 = vadd.f32 %v1021_v61, %v2585_v3  ;;  %v3106_v57 = vadd.f32 %v1019_v35, %v2575_v1  ;;  %v3111_v2 = vadd.f32 %v1022_v21, %v2590_v4  ;;  %v3538_v52 = vld [vmem:[#allocation9_spill] sm:$0xff]  ;;  %v3540_v28 = vld [vmem:[#allocation11_spill] sm:$0xff]  ;;  %s1362_s20 = sld [smem:[#allocation4]]  ;;  %s1777_s21 = sld [smem:[#allocation4 + $0x1]] }
 0x376   :  { %v3114_v0 = vadd.f32 %v1023_v23, %v2595_v5  ;;  %v3119_v3 = vadd.f32 %v1024_v40, %v2600_v6  ;;  %v3122_v1 = vadd.f32 %v1025_v24, %v2605_v7  ;;  %v3127_v4 = vadd.f32 %v1026_v17, %v2610_v8  ;;  %v3541_v29 = vld [vmem:[#allocation12_spill] sm:$0xff]  ;;  %v3542_v34 = vld [vmem:[#allocation13_spill] sm:$0xff]  ;;  %v3543_v47 = vld [vmem:[#allocation14_spill] sm:$0xff] }
 0x377   :  { %v3130_v5 = vadd.f32 %v1027_v19, %v2615_v9  ;;  %v3135_v6 = vadd.f32 %v1028_v53, %v2620_v10  ;;  %v3138_v7 = vadd.f32 %v1029_v27, %v2625_v11  ;;  %v3143_v8 = vadd.f32 %v1030_v55, %v2630_v12  ;;  %v3544_v22 = vld [vmem:[#allocation15_spill] sm:$0xff]  ;;  %v3545_v46 = vld [vmem:[#allocation16_spill] sm:$0xff]  ;;  %v3546_v49 = vld [vmem:[#allocation17_spill] sm:$0xff] }
 0x378   :  { %v3146_v9 = vadd.f32 %v1031_v54, %v2635_v13  ;;  %v3151_v10 = vadd.f32 %v1032_v16, %v2640_v14  ;;  %v3154_v11 = vadd.f32 %v1033_v39, %v2645_v15  ;;  %v2284_v12 = vpack.c.bf16 %v2704_v41, %v2668_v25  ;;  %v3539_v15 = vld [vmem:[#allocation10_spill] sm:$0xff]  ;;  %v3548_v20 = vld [vmem:[#allocation19_spill] sm:$0xff] }
 0x379   :  { %1075 = vadd.xlane.f32.xlu1 %v3103_v60  ;;  %1071 = vadd.xlane.f32.xlu0 %v3106_v57  ;;  %v2288_v13 = vpack.c.bf16 %v2716_v43, %v2709_v42  ;;  %v2292_v14 = vpack.c.bf16 %v3538_v52, %v2721_v44  ;;  %v2296_v58 = vpack.c.bf16 %v3540_v28, %v3539_v15  ;;  %v3547_v33 = vld [vmem:[#allocation18_spill] sm:$0xff] }
 0x37a   :  { %2285 = vmatprep.subr.bf16.mxu0 %v2284_v12  ;;  %v2300_v50 = vpack.c.bf16 %v3542_v34, %v3541_v29  ;;  %v2304_v48 = vpack.c.bf16 %v3544_v22, %v3543_v47  ;;  %v2308_v32 = vpack.c.bf16 %v3546_v49, %v3545_v46  ;;  %v2312_v62 = vpack.c.bf16 %v3548_v20, %v3547_v33 }
 0x37b   :  { %2287 = vmatpush3.bf16.msra.mxu0 %v2284_v12 }
 0x37c   :  { %2289 = vmatprep.subr.bf16.mxu0 %v2288_v13 }
 0x37d   :  { %1077 = vadd.xlane.f32.xlu0 %v3111_v2  ;;  %1079 = vadd.xlane.f32.xlu1 %v3114_v0 }
 0x37f   :  { %2291 = vmatpush3.bf16.msra.mxu0 %v2288_v13 }
 0x380   :  { %2293 = vmatprep.subr.bf16.mxu0 %v2292_v14 }
 0x381   :  { %1081 = vadd.xlane.f32.xlu0 %v3119_v3  ;;  %1083 = vadd.xlane.f32.xlu1 %v3122_v1 }
 0x383   :  { %2295 = vmatpush3.bf16.msra.mxu0 %v2292_v14 }
 0x384   :  { %2297 = vmatprep.subr.bf16.mxu0 %v2296_v58 }
 0x385   :  { %1085 = vadd.xlane.f32.xlu0 %v3127_v4  ;;  %1087 = vadd.xlane.f32.xlu1 %v3130_v5 }
 0x387   :  { %2299 = vmatpush3.bf16.msra.mxu0 %v2296_v58 }
 0x388   :  { %2301 = vmatprep.subr.bf16.mxu0 %v2300_v50 }
 0x389   :  { %1089 = vadd.xlane.f32.xlu0 %v3135_v6  ;;  %1091 = vadd.xlane.f32.xlu1 %v3138_v7 }
 0x38b   :  { %2303 = vmatpush3.bf16.msra.mxu0 %v2300_v50 }
 0x38c   :  { %2305 = vmatprep.subr.bf16.mxu0 %v2304_v48 }
 0x38d   :  { %1093 = vadd.xlane.f32.xlu0 %v3143_v8  ;;  %1095 = vadd.xlane.f32.xlu1 %v3146_v9 }
 0x38f   :  { %2307 = vmatpush3.bf16.msra.mxu0 %v2304_v48 }
 0x390   :  { %2309 = vmatprep.subr.bf16.mxu0 %v2308_v32 }
 0x391   :  { %1097 = vadd.xlane.f32.xlu0 %v3151_v10  ;;  %1099 = vadd.xlane.f32.xlu1 %v3154_v11 }
 0x393   :  { %2311 = vmatpush3.bf16.msra.mxu0 %v2308_v32 }
 0x394   :  { %2313 = vmatprep.subr.bf16.mxu0 %v2312_v62 }
 0x397   :  { %2315 = vmatpush3.bf16.msra.mxu0 %v2312_v62 }
 0x402   :  { %v1070_v31 = vpop.xlane.xlu0 %1069  ;;  %v1074_v59 = vpop.xlane.xlu1 %1073 }
 0x403   :  { %2479 = vrsqrt.f32 %v1070_v31  ;;  %vm1101_vm0 = vcmp.gt.f32.partialorder %v1070_v31, 0.0  ;;  %vm1103_vm2 = vcmp.gt.f32.partialorder %v1074_v59, 0.0 }
 0x406   :  { %v1072_v30 = vpop.xlane.xlu0 %1071  ;;  %v1076_v51 = vpop.xlane.xlu1 %1075 }
 0x407   :  { %2481 = vrsqrt.f32 %v1072_v30  ;;  %vm1102_vm1 = vcmp.gt.f32.partialorder %v1072_v30, 0.0  ;;  %vm1104_vm3 = vcmp.gt.f32.partialorder %v1076_v51, 0.0 }
 0x408   :  { %2483 = vrsqrt.f32 %v1074_v59 }
 0x409   :  { %2485 = vrsqrt.f32 %v1076_v51 }
 0x40a   :  { %v1078_v26 = vpop.xlane.xlu0 %1077  ;;  %v1080_v35 = vpop.xlane.xlu1 %1079 }
 0x40b   :  { %2487 = vrsqrt.f32 %v1078_v26  ;;  %vm1105_vm4 = vcmp.gt.f32.partialorder %v1078_v26, 0.0  ;;  %vm1106_vm5 = vcmp.gt.f32.partialorder %v1080_v35, 0.0 }
 0x40c   :  { %2489 = vrsqrt.f32 %v1080_v35 }
 0x40d   :  { %v2480_v37 = vpop.eup %2479 }
 0x40e   :  { %v3172_v38 = vsel %vm1101_vm0, %v2480_v37, 0.0  ;;  %v1082_v21 = vpop.xlane.xlu0 %1081  ;;  %v1084_v24 = vpop.xlane.xlu1 %1083 }
 0x40f   :  { %1165 = vxpose.xlu0.b32.start [1/16] (narrow) %v3172_v38, 8  ;;  %2491 = vrsqrt.f32 %v1082_v21  ;;  %vm1107_vm6 = vcmp.gt.f32.partialorder %v1082_v21, 0.0  ;;  %vm1108_vm7 = vcmp.gt.f32.partialorder %v1084_v24, 0.0 }
 0x410   :  { %2493 = vrsqrt.f32 %v1084_v24 }
 0x411   :  { %v2482_v56 = vpop.eup %2481 }
 0x412   :  { %v3177_v18 = vsel %vm1102_vm1, %v2482_v56, 0.0  ;;  %v2484_v61 = vpop.eup %2483  ;;  %v1086_v53 = vpop.xlane.xlu0 %1085 }
 0x413   :  { %1166 = vxpose.xlu0.b32.cont [2/16] (narrow) %v3177_v18, 8  ;;  %v3180_v23 = vsel %vm1103_vm2, %v2484_v61, 0.0  ;;  %v2486_v40 = vpop.eup %2485  ;;  %2495 = vrsqrt.f32 %v1086_v53  ;;  %v1088_v54 = vpop.xlane.xlu1 %1087  ;;  %vm1109_vm8 = vcmp.gt.f32.partialorder %v1086_v53, 0.0 }
 0x414   :  { %v3183_v17 = vsel %vm1104_vm3, %v2486_v40, 0.0  ;;  %2497 = vrsqrt.f32 %v1088_v54  ;;  %vm1110_vm9 = vcmp.gt.f32.partialorder %v1088_v54, 0.0 }
 0x415   :  { %v2488_v19 = vpop.eup %2487 }
 0x416   :  { %v3186_v27 = vsel %vm1105_vm4, %v2488_v19, 0.0  ;;  %v2490_v55 = vpop.eup %2489  ;;  %v1090_v12 = vpop.xlane.xlu0 %1089 }
 0x417   :  { %1167 = vxpose.xlu0.b32.cont [3/16] (narrow) %v3180_v23, 8  ;;  %v3189_v16 = vsel %vm1106_vm5, %v2490_v55, 0.0  ;;  %2499 = vrsqrt.f32 %v1090_v12  ;;  %v1092_v58 = vpop.xlane.xlu1 %1091  ;;  %vm1111_vm10 = vcmp.gt.f32.partialorder %v1090_v12, 0.0 }
 0x418   :  { %2501 = vrsqrt.f32 %v1092_v58  ;;  %vm1112_vm11 = vcmp.gt.f32.partialorder %v1092_v58, 0.0  ;;  %v1150_v58 = vmul.f32 %v3177_v18, %v3106_v57 }
 0x419   :  { %v2492_v39 = vpop.eup %2491 }
 0x41a   :  { %v3192_v13 = vsel %vm1107_vm6, %v2492_v39, 0.0  ;;  %v2494_v14 = vpop.eup %2493  ;;  %v1094_v32 = vpop.xlane.xlu0 %1093 }
 0x41b   :  { %1168 = vxpose.xlu0.b32.cont [4/16] (narrow) %v3183_v17, 8  ;;  %v3195_v50 = vsel %vm1108_vm7, %v2494_v14, 0.0  ;;  %2503 = vrsqrt.f32 %v1094_v32  ;;  %v1096_v30 = vpop.xlane.xlu1 %1095  ;;  %vm1113_vm12 = vcmp.gt.f32.partialorder %v1094_v32, 0.0  ;;  %v1149_v14 = vmul.f32 %v3172_v38, %v3098_v63 }
 0x41c   :  { %2505 = vrsqrt.f32 %v1096_v30  ;;  %vm1114_vm13 = vcmp.gt.f32.partialorder %v1096_v30, 0.0  ;;  %v1151_v32 = vmul.f32 %v3180_v23, %v3095_v45  ;;  %v1153_v63 = vmul.f32 %v3186_v27, %v3111_v2 }
 0x41d   :  { %v2496_v48 = vpop.eup %2495  ;;  %v1154_v45 = vmul.f32 %v3189_v16, %v3114_v0  ;;  %v1155_v38 = vmul.f32 %v3192_v13, %v3119_v3  ;;  %v1156_v2 = vmul.f32 %v3195_v50, %v3122_v1 }
 0x41e   :  { %v1141_v31 = vsel %vm1109_vm8, %v2496_v48, 0.0  ;;  %v2498_v59 = vpop.eup %2497  ;;  %v1098_v26 = vpop.xlane.xlu0 %1097 }
 0x41f   :  { %1169 = vxpose.xlu0.b32.cont [5/16] (narrow) %v3186_v27, 8  ;;  %v1142_v51 = vsel %vm1110_vm9, %v2498_v59, 0.0  ;;  %2507 = vrsqrt.f32 %v1098_v26  ;;  %v1100_v35 = vpop.xlane.xlu1 %1099  ;;  %vm1115_vm14 = vcmp.gt.f32.partialorder %v1098_v26, 0.0  ;;  %v1152_v26 = vmul.f32 %v3183_v17, %v3103_v60 }
 0x420   :  { %2509 = vrsqrt.f32 %v1100_v35  ;;  %vm1116_vm15 = vcmp.gt.f32.partialorder %v1100_v35, 0.0  ;;  %v1157_v23 = vmul.f32 %v1141_v31, %v3127_v4  ;;  %v1158_v3 = vmul.f32 %v1142_v51, %v3130_v5  ;;  %v1578_v35 = vld [vmem:[%s3501_s3 + $0x18] sm:$0xff] }
 0x421   :  { %v2500_v37 = vpop.eup %2499 }
 0x422   :  { %v1143_v62 = vsel %vm1111_vm10, %v2500_v37, 0.0  ;;  %v2502_v56 = vpop.eup %2501 }
 0x423   :  { %1170 = vxpose.xlu0.b32.cont [6/16] (narrow) %v3189_v16, 8  ;;  %v1144_v61 = vsel %vm1112_vm11, %v2502_v56, 0.0  ;;  %v1159_v27 = vmul.f32 %v1143_v62, %v3135_v6 }
 0x424   :  { %v1160_v4 = vmul.f32 %v1144_v61, %v3138_v7 }
 0x425   :  { %v2504_v21 = vpop.eup %2503 }
 0x426   :  { %v1145_v40 = vsel %vm1113_vm12, %v2504_v21, 0.0  ;;  %v2506_v24 = vpop.eup %2505  ;;  %v1579_v21 = vld [vmem:[%s3501_s3 + $0x20] sm:$0xff] }
 0x427   :  { %1171 = vxpose.xlu0.b32.cont [7/16] (narrow) %v3192_v13, 8  ;;  %v1146_v19 = vsel %vm1114_vm13, %v2506_v24, 0.0  ;;  %v1161_v13 = vmul.f32 %v1145_v40, %v3143_v8 }
 0x428   :  { %v1162_v6 = vmul.f32 %v1146_v19, %v3146_v9  ;;  %v1575_v9 = vld [vmem:[%s3501_s3] sm:$0xff] }
 0x429   :  { %v2508_v53 = vpop.eup %2507 }
 0x42a   :  { %v1147_v55 = vsel %vm1115_vm14, %v2508_v53, 0.0  ;;  %v2510_v54 = vpop.eup %2509  ;;  %v1582_v53 = vld [vmem:[%s3501_s3 + $0x38] sm:$0xff] }
 0x42b   :  { %1172 = vxpose.xlu0.b32.cont [8/16] (narrow) %v3195_v50, 8  ;;  %v1148_v39 = vsel %vm1116_vm15, %v2510_v54, 0.0  ;;  %v1583_v54 = vld [vmem:[%s3501_s3 + $0x40] sm:$0xff] }
 0x42c   :  { %v1164_v8 = vmul.f32 %v1148_v39, %v3154_v11  ;;  %v1577_v11 = vld [vmem:[%s3501_s3 + $0x10] sm:$0xff] }
 0x42f   :  { %1173 = vxpose.xlu0.b32.cont [9/16] (narrow) %v1141_v31, 8  ;;  %v1163_v31 = vmul.f32 %v1147_v55, %v3151_v10  ;;  %v1576_v10 = vld [vmem:[%s3501_s3 + $0x8] sm:$0xff] }
 0x430   :  { %v2348_v56 = vpack.c.bf16 %v1576_v10, %v1575_v9 }
 0x432   :  { %2349 = vmatprep.subr.bf16.mxu1 %v2348_v56 }
 0x433   :  { %1174 = vxpose.xlu0.b32.cont [10/16] (narrow) %v1142_v51, 8  ;;  %2351 = vmatpush3.bf16.msra.mxu1 %v2348_v56 }
 0x437   :  { %1175 = vxpose.xlu0.b32.cont [11/16] (narrow) %v1143_v62, 8 }
 0x43b   :  { %1176 = vxpose.xlu0.b32.cont [12/16] (narrow) %v1144_v61, 8  ;;  %v2352_v61 = vpack.c.bf16 %v1578_v35, %v1577_v11 }
 0x43d   :  { %2353 = vmatprep.subr.bf16.mxu1 %v2352_v61 }
 0x43e   :  { %2355 = vmatpush3.bf16.msra.mxu1 %v2352_v61 }
 0x43f   :  { %1177 = vxpose.xlu0.b32.cont [13/16] (narrow) %v1145_v40, 8  ;;  %v1580_v40 = vld [vmem:[%s3501_s3 + $0x28] sm:$0xff] }
 0x440   :  { %v2356_v24 = vpack.c.bf16 %v1580_v40, %v1579_v21 }
 0x442   :  { %2357 = vmatprep.subr.bf16.mxu1 %v2356_v24 }
 0x443   :  { %1178 = vxpose.xlu0.b32.cont [14/16] (narrow) %v1146_v19, 8  ;;  %v1581_v19 = vld [vmem:[%s3501_s3 + $0x30] sm:$0xff]  ;;  %2359 = vmatpush3.bf16.msra.mxu1 %v2356_v24 }
 0x447   :  { %1179 = vxpose.xlu0.b32.cont [15/16] (narrow) %v1147_v55, 8  ;;  %v2360_v55 = vpack.c.bf16 %v1582_v53, %v1581_v19 }
 0x449   :  { %2361 = vmatprep.subr.bf16.mxu1 %v2360_v55 }
 0x44a   :  { %2363 = vmatpush3.bf16.msra.mxu1 %v2360_v55 }
 0x44b   :  { %1180 = vxpose.xlu0.b32.end [16/16] (narrow) %v1148_v39, 8  ;;  %v1584_v39 = vld [vmem:[%s3501_s3 + $0x48] sm:$0xff] }
 0x48f   :  { %v1181_v12 = vpop.trf.xlu0 }
 0x490   :  { %v1200_v48 = vrot.slane %v1181_v12, %v2809_v36  ;;  %v2364_v12 = vpack.c.bf16 %v1584_v39, %v1583_v54 }
 0x492   :  { %v1201_v59 = vmul.f32 %v1200_v48, %v1149_v14  ;;  %v3205_v30 = vmul.f32 %v1200_v48, %v1150_v58  ;;  %v3207_v37 = vmul.f32 %v1200_v48, %v1151_v32  ;;  %v3215_v36 = vmul.f32 %v1200_v48, %v1152_v26  ;;  %v1585_v14 = vld [vmem:[%s3501_s3 + $0x50] sm:$0xff]  ;;  %v1586_v58 = vld [vmem:[%s3501_s3 + $0x58] sm:$0xff]  ;;  %2365 = vmatprep.subr.bf16.mxu1 %v2364_v12  ;;  %v1587_v32 = vld [vmem:[%s3501_s3 + $0x60] sm:$0xff] }
 0x493   :  { %v3217_v57 = vmul.f32 %v1200_v48, %v1153_v63  ;;  %v3225_v60 = vmul.f32 %v1200_v48, %v1154_v45  ;;  %v3227_v18 = vmul.f32 %v1200_v48, %v1155_v38  ;;  %v3234_v0 = vmul.f32 %v1200_v48, %v1156_v2  ;;  %2367 = vmatpush3.bf16.msra.mxu1 %v2364_v12 }
 0x494   :  { %2084 = vmatprep.mubr.f32.mxu0 %v1201_v59  ;;  %v3236_v17 = vmul.f32 %v1200_v48, %v1157_v23  ;;  %v3242_v16 = vmul.f32 %v1200_v48, %v1158_v3  ;;  %v3244_v1 = vmul.f32 %v1200_v48, %v1159_v27  ;;  %v3250_v50 = vmul.f32 %v1200_v48, %v1160_v4 }
 0x495   :  { %2085 = vmatmul.mubr.f32.vlgmr.msra.gmra.mrb[16].mxu0 %v3205_v30  ;;  %v3252_v5 = vmul.f32 %v1200_v48, %v1161_v13  ;;  %v3258_v51 = vmul.f32 %v1200_v48, %v1162_v6  ;;  %v3260_v7 = vmul.f32 %v1200_v48, %v1163_v31  ;;  %v3265_v62 = vmul.f32 %v1200_v48, %v1164_v8 }
 0x496   :  { %2087 = vmatprep.mubr.f32.mxu0 %v3207_v37  ;;  %v2368_v48 = vpack.c.bf16 %v1586_v58, %v1585_v14 }
 0x498   :  { %2369 = vmatprep.subr.bf16.mxu1 %v2368_v48 }
 0x499   :  { %2088 = vmatmul.mubr.f32.gmra.mrb[18].mxu0 %v3215_v36  ;;  %2371 = vmatpush3.bf16.msra.mxu1 %v2368_v48 }
 0x49a   :  { %2090 = vmatprep.mubr.f32.mxu0 %v3217_v57 }
 0x49d   :  { %2091 = vmatmul.mubr.f32.gmra.mrb[20].mxu0 %v3225_v60 }
 0x49e   :  { %2093 = vmatprep.mubr.f32.mxu0 %v3227_v18 }
 0x4a1   :  { %2094 = vmatmul.mubr.f32.gmra.mrb[22].mxu0 %v3234_v0 }
 0x4a2   :  { %2096 = vmatprep.mubr.f32.mxu0 %v3236_v17 }
 0x4a5   :  { %2097 = vmatmul.mubr.f32.gmra.mrb[24].mxu0 %v3242_v16 }
 0x4a6   :  { %2099 = vmatprep.mubr.f32.mxu0 %v3244_v1 }
 0x4a9   :  { %2100 = vmatmul.mubr.f32.gmra.mrb[26].mxu0 %v3250_v50 }
 0x4aa   :  { %2102 = vmatprep.mubr.f32.mxu0 %v3252_v5 }
 0x4ad   :  { %2103 = vmatmul.mubr.f32.gmra.mrb[28].mxu0 %v3258_v51 }
 0x4ae   :  { %2105 = vmatprep.mubr.f32.mxu0 %v3260_v7 }
 0x4b1   :  { %2106 = vmatmul.mubr.f32.gmra.mrb[30].mxu0 %v3265_v62 }
 0x4b2   :  { %2140 = vmatprep.mubr.f32.mxu0 %v1201_v59  ;;  %v1588_v59 = vld [vmem:[%s3501_s3 + $0x68] sm:$0xff] }
 0x4b3   :  { %v2372_v26 = vpack.c.bf16 %v1588_v59, %v1587_v32 }
 0x4b5   :  { %2373 = vmatprep.subr.bf16.mxu1 %v2372_v26 }
 0x4b6   :  { %2375 = vmatpush3.bf16.msra.mxu1 %v2372_v26 }
 0x568   :  { %v3310_v63 = vpop.f32.mrb[16].mxu0 }
 0x569   :  { %v3312_v45 = vpop.f32.mrb[17].mxu0 }
 0x56a   :  { %v2316_v38 = vpack.c.bf16 %v3310_v63, %v3312_v45 }
 0x56c   :  { %v3316_v2 = vpop.f32.mrb[18].mxu0  ;;  %2317 = vmatprep.subr.bf16.mxu0 %v2316_v38 }
 0x56d   :  { %v3318_v23 = vpop.f32.mrb[19].mxu0  ;;  %2319 = vmatpush3.bf16.msra.mxu0 %v2316_v38 }
 0x56e   :  { %v2320_v3 = vpack.c.bf16 %v3316_v2, %v3318_v23 }
 0x570   :  { %v3322_v27 = vpop.f32.mrb[20].mxu0  ;;  %2321 = vmatprep.subr.bf16.mxu0 %v2320_v3 }
 0x571   :  { %v3324_v4 = vpop.f32.mrb[21].mxu0  ;;  %2323 = vmatpush3.bf16.msra.mxu0 %v2320_v3 }
 0x572   :  { %v2324_v13 = vpack.c.bf16 %v3322_v27, %v3324_v4 }
 0x574   :  { %v3328_v6 = vpop.f32.mrb[22].mxu0  ;;  %2325 = vmatprep.subr.bf16.mxu0 %v2324_v13 }
 0x575   :  { %v3330_v31 = vpop.f32.mrb[23].mxu0  ;;  %2327 = vmatpush3.bf16.msra.mxu0 %v2324_v13 }
 0x576   :  { %v2328_v8 = vpack.c.bf16 %v3328_v6, %v3330_v31 }
 0x578   :  { %v3334_v9 = vpop.f32.mrb[24].mxu0  ;;  %2329 = vmatprep.subr.bf16.mxu0 %v2328_v8 }
 0x579   :  { %v3336_v10 = vpop.f32.mrb[25].mxu0  ;;  %2331 = vmatpush3.bf16.msra.mxu0 %v2328_v8 }
 0x57a   :  { %v2332_v11 = vpack.c.bf16 %v3334_v9, %v3336_v10 }
 0x57c   :  { %v3340_v56 = vpop.f32.mrb[26].mxu0  ;;  %2333 = vmatprep.subr.bf16.mxu0 %v2332_v11 }
 0x57d   :  { %v3342_v35 = vpop.f32.mrb[27].mxu0  ;;  %2335 = vmatpush3.bf16.msra.mxu0 %v2332_v11 }
 0x57e   :  { %v2336_v61 = vpack.c.bf16 %v3340_v56, %v3342_v35 }
 0x580   :  { %v3346_v21 = vpop.f32.mrb[28].mxu0  ;;  %2337 = vmatprep.subr.bf16.mxu0 %v2336_v61 }
 0x581   :  { %v3348_v40 = vpop.f32.mrb[29].mxu0  ;;  %2339 = vmatpush3.bf16.msra.mxu0 %v2336_v61 }
 0x582   :  { %v2340_v24 = vpack.c.bf16 %v3346_v21, %v3348_v40 }
 0x584   :  { %v3352_v19 = vpop.f32.mrb[30].mxu0  ;;  %2341 = vmatprep.subr.bf16.mxu0 %v2340_v24 }
 0x585   :  { %v3354_v53 = vpop.f32.mrb[31].mxu0  ;;  %2343 = vmatpush3.bf16.msra.mxu0 %v2340_v24 }
 0x586   :  { %v2344_v55 = vpack.c.bf16 %v3352_v19, %v3354_v53 }
 0x588   :  { %2345 = vmatprep.subr.bf16.mxu0 %v2344_v55 }
 0x589   :  { %2347 = vmatpush3.bf16.msra.mxu0 %v2344_v55 }
 0x58c   :  { %2141 = vmatmul.mubr.f32.vlgmr.msra.gmra.mrb[32].mxu0 %v3205_v30  ;;  %v1589_v30 = vld [vmem:[%s3501_s3 + $0x70] sm:$0xff] }
 0x58d   :  { %2143 = vmatprep.mubr.f32.mxu0 %v3207_v37  ;;  %v1590_v37 = vld [vmem:[%s3501_s3 + $0x78] sm:$0xff] }
 0x590   :  { %2144 = vmatmul.mubr.f32.gmra.mrb[34].mxu0 %v3215_v36  ;;  %v2376_v36 = vpack.c.bf16 %v1590_v37, %v1589_v30 }
 0x591   :  { %2146 = vmatprep.mubr.f32.mxu0 %v3217_v57  ;;  %v3379_v57 = vstv %s1362_s20 }
 0x592   :  { %2377 = vmatprep.subr.bf16.mxu1 %v2376_v36  ;;  %v1368_v59 = vmul.f32 %v3379_v57, %v3324_v4  ;;  %v1371_v38 = vmul.f32 %v3328_v6, %v3379_v57  ;;  %v1370_v3 = vmul.f32 %v3379_v57, %v3330_v31  ;;  %v1373_v6 = vmul.f32 %v3334_v9, %v3379_v57 }
 0x593   :  { %2379 = vmatpush3.bf16.msra.mxu1 %v2376_v36  ;;  %v1372_v31 = vmul.f32 %v3379_v57, %v3336_v10  ;;  %v1375_v9 = vmul.f32 %v3340_v56, %v3379_v57  ;;  %v1374_v10 = vmul.f32 %v3379_v57, %v3342_v35  ;;  %v1377_v56 = vmul.f32 %v3346_v21, %v3379_v57 }
 0x594   :  { %2147 = vmatmul.mubr.f32.gmra.mrb[36].mxu0 %v3225_v60  ;;  %v1365_v60 = vmul.f32 %v3310_v63, %v3379_v57  ;;  %v1376_v35 = vmul.f32 %v3379_v57, %v3348_v40  ;;  %v1379_v21 = vmul.f32 %v3352_v19, %v3379_v57  ;;  %v1378_v40 = vmul.f32 %v3379_v57, %v3354_v53 }
 0x595   :  { %2149 = vmatprep.mubr.f32.mxu0 %v3227_v18  ;;  %v1364_v18 = vmul.f32 %v3379_v57, %v3312_v45 }
 0x598   :  { %2150 = vmatmul.mubr.f32.gmra.mrb[38].mxu0 %v3234_v0  ;;  %v3385_v0 = vstv %s1777_s21 }
 0x599   :  { %2152 = vmatprep.mubr.f32.mxu0 %v3236_v17 }
 0x59c   :  { %2153 = vmatmul.mubr.f32.gmra.mrb[40].mxu0 %v3242_v16  ;;  %v1381_v16 = vadd.f32 %v1365_v60, %v2704_v41  ;;  %v1369_v41 = vmul.f32 %v3322_v27, %v3379_v57 }
 0x59d   :  { %2155 = vmatprep.mubr.f32.mxu0 %v3244_v1  ;;  %v1367_v1 = vmul.f32 %v3316_v2, %v3379_v57 }
 0x59f   :  { %v1383_v14 = vadd.f32 %v1367_v1, %v2716_v43  ;;  %v1385_v43 = vadd.f32 %v1369_v41, %v3538_v52  ;;  %v1387_v52 = vadd.f32 %v1371_v38, %v3540_v28  ;;  %v1389_v28 = vadd.f32 %v1373_v6, %v3542_v34 }
 0x5a0   :  { %2156 = vmatmul.mubr.f32.gmra.mrb[42].mxu0 %v3250_v50  ;;  %v1391_v34 = vadd.f32 %v1375_v9, %v3544_v22  ;;  %v1393_v22 = vadd.f32 %v1377_v56, %v3546_v49  ;;  %v1395_v49 = vadd.f32 %v1379_v21, %v3548_v20 }
 0x5a1   :  { %2158 = vmatprep.mubr.f32.mxu0 %v3252_v5 }
 0x5a4   :  { %2159 = vmatmul.mubr.f32.gmra.mrb[44].mxu0 %v3258_v51  ;;  %v1366_v51 = vmul.f32 %v3379_v57, %v3318_v23  ;;  %v1778_v57 = vld [vmem:[%s3502_s4] ss:$0 sm:$0xff] }
 0x5a5   :  { %2161 = vmatprep.mubr.f32.mxu0 %v3260_v7 }
 0x5a6   :  { %v1382_v32 = vadd.f32 %v1366_v51, %v2709_v42  ;;  %v1384_v42 = vadd.f32 %v1368_v59, %v2721_v44  ;;  %v1386_v44 = vadd.f32 %v1370_v3, %v3539_v15  ;;  %v1388_v15 = vadd.f32 %v1372_v31, %v3541_v29 }
 0x5a7   :  { %v1390_v29 = vadd.f32 %v1374_v10, %v3543_v47  ;;  %v1392_v47 = vadd.f32 %v1376_v35, %v3545_v46  ;;  %v1394_v59 = vadd.f32 %v1378_v40, %v3547_v33 }
 0x5a8   :  { %2162 = vmatmul.mubr.f32.gmra.mrb[46].mxu0 %v3265_v62  ;;  %v1380_v62 = vadd.f32 %v1364_v18, %v2668_v25 }
 0x65f   :  { %v2142_v17 = vpop.f32.mrb[32].mxu0 }
 0x660   :  { %v1544_v50 = vmul.f32 %v2142_v17, %v3385_v0  ;;  %v1462_v5 = vpop.f32.mrb[33].mxu0 }
 0x661   :  { %v1543_v7 = vmul.f32 %v3385_v0, %v1462_v5 }
 0x662   :  { %v1560_v54 = vadd.f32 %v1544_v50, %v1381_v16 }
 0x663   :  { %v2145_v39 = vpop.f32.mrb[34].mxu0  ;;  %v1559_v12 = vadd.f32 %v1543_v7, %v1380_v62 }
 0x664   :  { %v1546_v58 = vmul.f32 %v2145_v39, %v3385_v0  ;;  %v1472_v48 = vpop.f32.mrb[35].mxu0 }
 0x665   :  { %v1545_v26 = vmul.f32 %v3385_v0, %v1472_v48  ;;  %2196 = vmatprep.mubr.f32.mxu1 %v1559_v12 }
 0x666   :  { %v1562_v25 = vadd.f32 %v1546_v58, %v1383_v14  ;;  %2197 = vmatmul.mubr.f32.vlgmr.msra.gmra.mrb[16].mxu1 %v1560_v54 }
 0x667   :  { %v1561_v63 = vadd.f32 %v1545_v26, %v1382_v32  ;;  %v2148_v45 = vpop.f32.mrb[36].mxu0 }
 0x668   :  { %v1548_v2 = vmul.f32 %v2148_v45, %v3385_v0  ;;  %v1482_v23 = vpop.f32.mrb[37].mxu0 }
 0x669   :  { %v1547_v27 = vmul.f32 %v3385_v0, %v1482_v23  ;;  %2199 = vmatprep.mubr.f32.mxu1 %v1561_v63 }
 0x66a   :  { %v1564_v4 = vadd.f32 %v1548_v2, %v1385_v43  ;;  %2200 = vmatmul.mubr.f32.gmra.mrb[18].mxu1 %v1562_v25 }
 0x66b   :  { %v1563_v13 = vadd.f32 %v1547_v27, %v1384_v42  ;;  %v2151_v8 = vpop.f32.mrb[38].mxu0 }
 0x66c   :  { %v1550_v11 = vmul.f32 %v2151_v8, %v3385_v0  ;;  %v1492_v61 = vpop.f32.mrb[39].mxu0 }
 0x66d   :  { %v1549_v24 = vmul.f32 %v3385_v0, %v1492_v61  ;;  %2202 = vmatprep.mubr.f32.mxu1 %v1563_v13 }
 0x66e   :  { %v1566_v55 = vadd.f32 %v1550_v11, %v1387_v52  ;;  %2203 = vmatmul.mubr.f32.gmra.mrb[20].mxu1 %v1564_v4 }
 0x66f   :  { %v1565_v30 = vadd.f32 %v1549_v24, %v1386_v44  ;;  %v2154_v37 = vpop.f32.mrb[40].mxu0 }
 0x670   :  { %v1552_v36 = vmul.f32 %v2154_v37, %v3385_v0  ;;  %v1502_v60 = vpop.f32.mrb[41].mxu0 }
 0x671   :  { %v1551_v18 = vmul.f32 %v3385_v0, %v1502_v60  ;;  %2205 = vmatprep.mubr.f32.mxu1 %v1565_v30 }
 0x672   :  { %v1568_v17 = vadd.f32 %v1552_v36, %v1389_v28  ;;  %2206 = vmatmul.mubr.f32.gmra.mrb[22].mxu1 %v1566_v55 }
 0x673   :  { %v1567_v16 = vadd.f32 %v1551_v18, %v1388_v15  ;;  %v2157_v1 = vpop.f32.mrb[42].mxu0 }
 0x674   :  { %v1554_v50 = vmul.f32 %v2157_v1, %v3385_v0  ;;  %v1512_v5 = vpop.f32.mrb[43].mxu0 }
 0x675   :  { %v1553_v51 = vmul.f32 %v3385_v0, %v1512_v5  ;;  %2208 = vmatprep.mubr.f32.mxu1 %v1567_v16 }
 0x676   :  { %v1570_v7 = vadd.f32 %v1554_v50, %v1391_v34  ;;  %2209 = vmatmul.mubr.f32.gmra.mrb[24].mxu1 %v1568_v17 }
 0x677   :  { %v1569_v62 = vadd.f32 %v1553_v51, %v1390_v29  ;;  %v2160_v54 = vpop.f32.mrb[44].mxu0 }
 0x678   :  { %v1556_v39 = vmul.f32 %v2160_v54, %v3385_v0  ;;  %v1522_v12 = vpop.f32.mrb[45].mxu0 }
 0x679   :  { %v1555_v14 = vmul.f32 %v3385_v0, %v1522_v12  ;;  %2211 = vmatprep.mubr.f32.mxu1 %v1569_v62 }
 0x67a   :  { %v1572_v41 = vadd.f32 %v1556_v39, %v1393_v22  ;;  %2212 = vmatmul.mubr.f32.gmra.mrb[26].mxu1 %v1570_v7 }
 0x67b   :  { %v1571_v58 = vadd.f32 %v1555_v14, %v1392_v47  ;;  %v2163_v48 = vpop.f32.mrb[46].mxu0 }
 0x67c   :  { %v1558_v32 = vmul.f32 %v2163_v48, %v3385_v0  ;;  %v1532_v19 = vpop.f32.mrb[47].mxu0 }
 0x67d   :  { %v1557_v26 = vmul.f32 %v3385_v0, %v1532_v19  ;;  %2214 = vmatprep.mubr.f32.mxu1 %v1571_v58 }
 0x67e   :  { %v1574_v46 = vadd.f32 %v1558_v32, %v1395_v49  ;;  %2215 = vmatmul.mubr.f32.gmra.mrb[28].mxu1 %v1572_v41 }
 0x67f   :  { %v1573_v53 = vadd.f32 %v1557_v26, %v1394_v59 }
 0x681   :  { %2217 = vmatprep.mubr.f32.mxu1 %v1573_v53 }
 0x682   :  { %2218 = vmatmul.mubr.f32.gmra.mrb[30].mxu1 %v1574_v46 }
 0x739   :  { %v2198_v25 = vpop.f32.mrb[16].mxu1 }
 0x73a   :  { %v1669_v63 = vadd.f32 %v2198_v25, %v1778_v57  ;;  %v1663_v20 = vpop.f32.mrb[17].mxu1 }
 0x73b   :  { %v1664_v45 = vadd.f32 %v1778_v57, %v1663_v20 }
 0x73c   :  { %1743 = vst [vmem:[%s3504_s6 + $0x8] sm:$0xff] %v1669_v63 }
 0x73d   :  { %1742 = vst [vmem:[%s3504_s6] sm:$0xff] %v1664_v45  ;;  %v2201_v33 = vpop.f32.mrb[18].mxu1 }
 0x73e   :  { %v1679_v0 = vadd.f32 %v2201_v33, %v1778_v57  ;;  %v1673_v43 = vpop.f32.mrb[19].mxu1 }
 0x73f   :  { %v1674_v38 = vadd.f32 %v1778_v57, %v1673_v43 }
 0x740   :  { %1745 = vst [vmem:[%s3504_s6 + $0x18] sm:$0xff] %v1679_v0 }
 0x741   :  { %1744 = vst [vmem:[%s3504_s6 + $0x10] sm:$0xff] %v1674_v38  ;;  %v2204_v2 = vpop.f32.mrb[20].mxu1 }
 0x742   :  { %v1689_v23 = vadd.f32 %v2204_v2, %v1778_v57  ;;  %v1683_v42 = vpop.f32.mrb[21].mxu1 }
 0x743   :  { %v1684_v3 = vadd.f32 %v1778_v57, %v1683_v42 }
 0x744   :  { %1747 = vst [vmem:[%s3504_s6 + $0x28] sm:$0xff] %v1689_v23 }
 0x745   :  { %1746 = vst [vmem:[%s3504_s6 + $0x20] sm:$0xff] %v1684_v3  ;;  %v2207_v27 = vpop.f32.mrb[22].mxu1 }
 0x746   :  { %v1699_v4 = vadd.f32 %v2207_v27, %v1778_v57  ;;  %v1693_v13 = vpop.f32.mrb[23].mxu1 }
 0x747   :  { %v1694_v8 = vadd.f32 %v1778_v57, %v1693_v13 }
 0x748   :  { %1749 = vst [vmem:[%s3504_s6 + $0x38] sm:$0xff] %v1699_v4 }
 0x749   :  { %1748 = vst [vmem:[%s3504_s6 + $0x30] sm:$0xff] %v1694_v8  ;;  %v2210_v52 = vpop.f32.mrb[24].mxu1 }
 0x74a   :  { %v1709_v6 = vadd.f32 %v2210_v52, %v1778_v57  ;;  %v1703_v11 = vpop.f32.mrb[25].mxu1 }
 0x74b   :  { %v1704_v61 = vadd.f32 %v1778_v57, %v1703_v11 }
 0x74c   :  { %1751 = vst [vmem:[%s3504_s6 + $0x48] sm:$0xff] %v1709_v6 }
 0x74d   :  { %1750 = vst [vmem:[%s3504_s6 + $0x40] sm:$0xff] %v1704_v61  ;;  %v2213_v44 = vpop.f32.mrb[26].mxu1 }
 0x74e   :  { %v1719_v31 = vadd.f32 %v2213_v44, %v1778_v57  ;;  %v1713_v24 = vpop.f32.mrb[27].mxu1 }
 0x74f   :  { %v1714_v55 = vadd.f32 %v1778_v57, %v1713_v24 }
 0x750   :  { %1753 = vst [vmem:[%s3504_s6 + $0x58] sm:$0xff] %v1719_v31 }
 0x751   :  { %1752 = vst [vmem:[%s3504_s6 + $0x50] sm:$0xff] %v1714_v55  ;;  %v2216_v30 = vpop.f32.mrb[28].mxu1 }
 0x752   :  { %v1729_v37 = vadd.f32 %v2216_v30, %v1778_v57  ;;  %v1723_v28 = vpop.f32.mrb[29].mxu1 }
 0x753   :  { %v1724_v9 = vadd.f32 %v1778_v57, %v1723_v28 }
 0x754   :  { %1755 = vst [vmem:[%s3504_s6 + $0x68] sm:$0xff] %v1729_v37 }
 0x755   :  { %1754 = vst [vmem:[%s3504_s6 + $0x60] sm:$0xff] %v1724_v9  ;;  %v2219_v36 = vpop.f32.mrb[30].mxu1 }
 0x756   :  { %v1739_v60 = vadd.f32 %v2219_v36, %v1778_v57  ;;  %v1733_v15 = vpop.f32.mrb[31].mxu1 }
 0x757   :  { %v1734_v10 = vadd.f32 %v1778_v57, %v1733_v15 }
 0x758   :  { %1757 = vst [vmem:[%s3504_s6 + $0x78] sm:$0xff] %v1739_v60 }
 0x759   :  { %1756 = vst [vmem:[%s3504_s6 + $0x70] sm:$0xff] %v1734_v10 }
 0x75a   :  { %1762 = vsyncpa [#allocation5], 1 }
 0x75b   :  { %1763 = vsyncmov [#allocation3] }
 0x75e   :  { %s1764_s25 = vpop.sfrf %1763 }
 0x75f   :  { %p1779_p5 = scmp.ne.s32.totalorder %s1764_s25, 0 }
 0x761   :  { %1768 = shalt.err (%p1779_p5)  }

</bundles_post_ra>
